<compile_context>
chip_gen: v7x
topology: tpu7x:2x2x1
jax: 0.10.0
libtpu: 0.0.40
codegen_flags: <defaults>
</compile_context>

<pallas_src>
import math

import jax
import jax.numpy as jnp
from jax.experimental import pallas as pl
from jax.experimental.pallas import tpu as pltpu

# ----------------------------- model config --------------------------------
BATCH = 2
SEQ_LEN = 8          # sequence_length (AvgPool1d kernel size)
VOCAB = 100
MAX_POS = 64
DIM = 32             # distilbert.config.dim
N_LAYERS = 2
N_HEADS = 4
HEAD_DIM = DIM // N_HEADS
FFN_DIM = 4 * DIM    # distilbert hidden_dim
FC_HIDDEN = 32       # recommender hidden_size
NUM_CLASSES = 5
LN_EPS = 1e-12
LANE = 128           # lane-dense padded width for the logits store
BS = BATCH * SEQ_LEN # batch collapsed onto sublanes: (BS, DIM) activation slab
NEG_FILL = float(jnp.finfo(jnp.float32).min)

# Row layout of the packed (VEC_ROWS, 128) bias / LayerNorm slab.
ROW_EMB_G, ROW_EMB_B = 0, 1
ROW_LAYER0 = 2
ROWS_PER_LAYER = 8
(OFF_BQKV, OFF_BO, OFF_SA_G, OFF_SA_B,
 OFF_B1, OFF_B2, OFF_OUT_G, OFF_OUT_B) = range(8)
ROW_HEAD_B = ROW_LAYER0 + N_LAYERS * ROWS_PER_LAYER      # 18
VEC_ROWS = ((ROW_HEAD_B + 1 + 7) // 8) * 8               # 24


# --------------------------- fused Pallas kernel ----------------------------
def _fused_model_kernel(ids_ref, mask_ref, emb_ref, pos_ref, vecs_ref,
                        wqkv_ref, wo_ref, w1_ref, w2_ref, head_w_ref, o_ref):
    """Embeddings + 2-layer DistilBERT encoder + AvgPool + folded head, one shot."""
    f32 = jnp.float32

    def layer_norm(v, g, b):
        mu = jnp.mean(v, axis=-1, keepdims=True)
        vc = v - mu
        var = jnp.mean(vc * vc, axis=-1, keepdims=True)
        return vc * jax.lax.rsqrt(var + LN_EPS) * g + b

    def erf(v):
        # Abramowitz & Stegun 7.1.26 (~1.5e-7 abs err): exact-erf GELU stand-in
        # built only from exp / mul / add / select / reciprocal.
        av = jnp.abs(v)
        t = pl.reciprocal(1.0 + 0.3275911 * av, approx=True)
        poly = t * (0.254829592 + t * (-0.284496736 + t * (1.421413741
                    + t * (-1.453152027 + t * 1.061405429))))
        e = 1.0 - poly * jnp.exp(-av * av)
        return jnp.where(v < 0.0, -e, e)

    def gelu(v):
        return 0.5 * v * (1.0 + erf(v * 0.7071067811865476))

    vecs = vecs_ref[...]                                   # (VEC_ROWS, 128) slab

    def vec(row, width):                                   # (1, width) bias/LN row
        return vecs[row:row + 1, :width]

    # ---- fused embedding lookup: one-hot(ids) @ word_emb (no XLA gather) ----
    vocab_iota = jax.lax.broadcasted_iota(jnp.int32, (1, VOCAB), 1)
    onehot = (ids_ref[...] == vocab_iota).astype(f32)      # (BS, VOCAB)
    x = jnp.dot(onehot, emb_ref[...], preferred_element_type=f32) + pos_ref[...]
    x = layer_norm(x, vec(ROW_EMB_G, DIM), vec(ROW_EMB_B, DIM))

    # ---- additive attention bias (hoisted): key padding + block-diag batch ----
    mask2d = mask_ref[...]                                 # (B, S) int32
    row_blocks = []
    for brow in range(BATCH):
        cols = []
        for bcol in range(BATCH):
            if brow == bcol:
                keep = mask2d[bcol:bcol + 1, :] > 0        # (1, S) key keep-mask
                cols.append(jnp.broadcast_to(
                    jnp.where(keep, 0.0, NEG_FILL), (SEQ_LEN, SEQ_LEN)))
            else:                                          # different batch -> masked
                cols.append(jnp.full((SEQ_LEN, SEQ_LEN), NEG_FILL, f32))
        row_blocks.append(jnp.concatenate(cols, axis=1))
    bias = jnp.concatenate(row_blocks, axis=0)             # (BS, BS), reused 8x

    # ---- 2-layer DistilBERT encoder (batch collapsed along sublanes) ----
    for l in range(N_LAYERS):                              # static unroll over layers
        base = ROW_LAYER0 + l * ROWS_PER_LAYER
        # fused QKV projection: one (BS,D)@(D,3D) matmul, scale pre-folded into Q
        qkv = (jnp.dot(x, wqkv_ref[l], preferred_element_type=f32)
               + vec(base + OFF_BQKV, 3 * DIM))

        ctx_heads = []
        for h in range(N_HEADS):                           # heads = static lane slices
            lo = h * HEAD_DIM
            q_h = qkv[:, lo:lo + HEAD_DIM]
            k_h = qkv[:, DIM + lo:DIM + lo + HEAD_DIM]
            v_h = qkv[:, 2 * DIM + lo:2 * DIM + lo + HEAD_DIM]
            s = jax.lax.dot_general(q_h, k_h, (((1,), (1,)), ((), ())),
                                    preferred_element_type=f32) + bias  # (BS, BS)
            s = s - jnp.max(s, axis=-1, keepdims=True)
            p = jnp.exp(s)
            p = p * pl.reciprocal(jnp.sum(p, axis=-1, keepdims=True), approx=True)
            ctx_heads.append(jnp.dot(p, v_h, preferred_element_type=f32))
        ctx = jnp.concatenate(ctx_heads, axis=-1)          # (BS, D)

        attn = (jnp.dot(ctx, wo_ref[l], preferred_element_type=f32)
                + vec(base + OFF_BO, DIM))
        x = layer_norm(attn + x, vec(base + OFF_SA_G, DIM), vec(base + OFF_SA_B, DIM))

        h1 = gelu(jnp.dot(x, w1_ref[l], preferred_element_type=f32)
                  + vec(base + OFF_B1, FFN_DIM))
        h2 = jnp.dot(h1, w2_ref[l], preferred_element_type=f32) + vec(base + OFF_B2, DIM)
        x = layer_norm(h2 + x, vec(base + OFF_OUT_G, DIM), vec(base + OFF_OUT_B, DIM))

    # ---- AvgPool1d over each sequence + folded fc/output_layer (lane-dense) ----
    pooled = jnp.concatenate(
        [jnp.mean(x[b * SEQ_LEN:(b + 1) * SEQ_LEN, :], axis=0, keepdims=True)
         for b in range(BATCH)], axis=0)                   # (B, D)
    logits = (jnp.dot(pooled, head_w_ref[...], preferred_element_type=f32)
              + vec(ROW_HEAD_B, LANE))                     # (B, LANE)
    o_ref[...] = logits.astype(o_ref.dtype)


def fused_forward(ids_col, mask, fp):
    vmem = pl.BlockSpec(memory_space=pltpu.MemorySpace.VMEM)  # whole array, VMEM-resident
    return pl.pallas_call(
        _fused_model_kernel,
        out_shape=jax.ShapeDtypeStruct((BATCH, LANE), jnp.float32),
        in_specs=[vmem] * 10,
        out_specs=vmem,
    )(ids_col, mask,
      fp["word_emb"], fp["pos_bs"], fp["vecs"],
      fp["wqkv"], fp["wo"], fp["w1"], fp["w2"], fp["head_w"])


# ------------------------------ model glue ----------------------------------
def model_forward(fp, input_ids, attention_mask):
    # Only glue left outside the kernel: a 64-byte reshape of the ids and the
    # final slice of the lane-padded logits.
    ids_col = input_ids.astype(jnp.int32).reshape(BS, 1)
    mask = attention_mask.astype(jnp.int32)                # (B, S), converted in-kernel
    logits_pad = fused_forward(ids_col, mask, fp)           # (B, LANE)
    return logits_pad[:, :NUM_CLASSES]                      # (B, NUM_CLASSES)


# --------------------------- parameter handling ------------------------------
def init_params(key):
    def norm(k, shape):
        return (0.02 * jax.random.normal(k, shape)).astype(jnp.float32)

    keys = jax.random.split(key, 4 + N_LAYERS)
    params = {
        "word_emb": norm(keys[0], (VOCAB, DIM)),
        "pos_emb": norm(keys[1], (MAX_POS, DIM)),
        "emb_ln_g": jnp.ones((DIM,), jnp.float32),
        "emb_ln_b": jnp.zeros((DIM,), jnp.float32),
        "layers": [],
        "fc_w": norm(keys[2], (DIM, FC_HIDDEN)),
        "fc_b": jnp.zeros((FC_HIDDEN,), jnp.float32),
        "out_w": norm(keys[3], (FC_HIDDEN, NUM_CLASSES)),
        "out_b": jnp.zeros((NUM_CLASSES,), jnp.float32),
    }
    for i in range(N_LAYERS):
        lk = jax.random.split(keys[4 + i], 6)
        params["layers"].append({
            "wq": norm(lk[0], (DIM, DIM)), "bq": jnp.zeros((DIM,), jnp.float32),
            "wk": norm(lk[1], (DIM, DIM)), "bk": jnp.zeros((DIM,), jnp.float32),
            "wv": norm(lk[2], (DIM, DIM)), "bv": jnp.zeros((DIM,), jnp.float32),
            "wo": norm(lk[3], (DIM, DIM)), "bo": jnp.zeros((DIM,), jnp.float32),
            "sa_ln_g": jnp.ones((DIM,), jnp.float32),
            "sa_ln_b": jnp.zeros((DIM,), jnp.float32),
            "w1": norm(lk[4], (DIM, FFN_DIM)), "b1": jnp.zeros((FFN_DIM,), jnp.float32),
            "w2": norm(lk[5], (FFN_DIM, DIM)), "b2": jnp.zeros((DIM,), jnp.float32),
            "out_ln_g": jnp.ones((DIM,), jnp.float32),
            "out_ln_b": jnp.zeros((DIM,), jnp.float32),
        })
    return params


def prepare_fused_params(params):
    """Torch-style per-layer params -> packed, kernel-ready arrays (done once)."""
    scale = 1.0 / math.sqrt(HEAD_DIM)

    def pad_row(v):
        v = jnp.asarray(v, jnp.float32).reshape(-1)
        return jnp.pad(v, (0, LANE - v.shape[0]))

    vec_rows = [pad_row(params["emb_ln_g"]), pad_row(params["emb_ln_b"])]
    wqkv, wo, w1, w2 = [], [], [], []
    for layer in params["layers"]:
        wq = layer["wq"] * scale              # fold 1/sqrt(head_dim) into Q projection
        bq = layer["bq"] * scale
        wqkv.append(jnp.concatenate([wq, layer["wk"], layer["wv"]], axis=1))
        wo.append(layer["wo"])
        w1.append(layer["w1"])
        w2.append(layer["w2"])
        vec_rows.append(pad_row(jnp.concatenate([bq, layer["bk"], layer["bv"]])))
        vec_rows.append(pad_row(layer["bo"]))
        vec_rows.append(pad_row(layer["sa_ln_g"]))
        vec_rows.append(pad_row(layer["sa_ln_b"]))
        vec_rows.append(pad_row(layer["b1"]))
        vec_rows.append(pad_row(layer["b2"]))
        vec_rows.append(pad_row(layer["out_ln_g"]))
        vec_rows.append(pad_row(layer["out_ln_b"]))

    # Fold fc + output_layer (no activation between them in the reference).
    head_w = params["fc_w"] @ params["out_w"]                          # (D, C)
    head_b = params["fc_b"] @ params["out_w"] + params["out_b"]        # (C,)
    vec_rows.append(pad_row(head_b))
    assert len(vec_rows) == ROW_HEAD_B + 1
    vec_rows += [jnp.zeros((LANE,), jnp.float32)] * (VEC_ROWS - len(vec_rows))

    return {
        "word_emb": params["word_emb"].astype(jnp.float32),
        "pos_bs": jnp.tile(params["pos_emb"][:SEQ_LEN], (BATCH, 1)).astype(jnp.float32),
        "vecs": jnp.stack(vec_rows),                                   # (VEC_ROWS, 128)
        "wqkv": jnp.stack(wqkv),                                       # (L, D, 3D)
        "wo": jnp.stack(wo),                                           # (L, D, D)
        "w1": jnp.stack(w1),                                           # (L, D, FFN)
        "w2": jnp.stack(w2),                                           # (L, FFN, D)
        "head_w": jnp.pad(head_w, ((0, 0), (0, LANE - NUM_CLASSES))),  # (D, 128)
    }


# ---------------------------------- main -------------------------------------
if __name__ == "__main__":
    root = jax.random.PRNGKey(0)
    pkey, ikey = jax.random.split(root)

    params = init_params(pkey)
    fused_params = prepare_fused_params(params)

    input_ids = jax.random.randint(ikey, (BATCH, SEQ_LEN), 0, VOCAB, dtype=jnp.int32)
    attention_mask = jnp.ones((BATCH, SEQ_LEN), jnp.int32).at[1, 6:].set(0)

    logits = jax.jit(model_forward)(fused_params, input_ids, attention_mask)
    jax.block_until_ready(logits)

    assert logits.shape == (BATCH, NUM_CLASSES), logits.shape
    assert bool(jnp.all(jnp.isfinite(logits)))
    print("KERNEL_OK")
</pallas_src>

<mosaic_0001>
module attributes {stable_mosaic.version = 11 : i64} {
  func.func @_fused_model_kernel(%arg0: memref<16x1xi32, #tpu.memory_space<vmem>>, %arg1: memref<2x8xi32, #tpu.memory_space<vmem>>, %arg2: memref<100x32xf32, #tpu.memory_space<vmem>>, %arg3: memref<16x32xf32, #tpu.memory_space<vmem>>, %arg4: memref<24x128xf32, #tpu.memory_space<vmem>>, %arg5: memref<2x32x96xf32, #tpu.memory_space<vmem>>, %arg6: memref<2x32x32xf32, #tpu.memory_space<vmem>>, %arg7: memref<2x32x128xf32, #tpu.memory_space<vmem>>, %arg8: memref<2x128x32xf32, #tpu.memory_space<vmem>>, %arg9: memref<32x128xf32, #tpu.memory_space<vmem>>, %arg10: memref<2x128xf32, #tpu.memory_space<vmem>>) attributes {dimension_semantics = [], scalar_prefetch = 0 : i64, scratch_operands = 0 : i64, tpu.core_type = #tpu.core_type<tc>} {
    %c0 = arith.constant 0 : index
    %c0_0 = arith.constant 0 : index
    %0 = vector.load %arg4[%c0, %c0_0] : memref<24x128xf32, #tpu.memory_space<vmem>>, vector<24x128xf32>
    %1 = tpu.iota {dimensions = array<i32: 1>} : vector<1x100xi32>
    %c0_1 = arith.constant 0 : index
    %c0_2 = arith.constant 0 : index
    %2 = vector.load %arg0[%c0_1, %c0_2] : memref<16x1xi32, #tpu.memory_space<vmem>>, vector<16x1xi32>
    %3 = vector.broadcast %2 : vector<16x1xi32> to vector<16x100xi32>
    %4 = vector.broadcast %1 : vector<1x100xi32> to vector<16x100xi32>
    %5 = arith.cmpi eq, %3, %4 : vector<16x100xi32>
    %6 = arith.extui %5 : vector<16x100xi1> to vector<16x100xi32>
    %7 = arith.sitofp %6 : vector<16x100xi32> to vector<16x100xf32>
    %c0_3 = arith.constant 0 : index
    %c0_4 = arith.constant 0 : index
    %8 = vector.load %arg2[%c0_3, %c0_4] : memref<100x32xf32, #tpu.memory_space<vmem>>, vector<100x32xf32>
    %cst = arith.constant dense<0.000000e+00> : vector<16x32xf32>
    %9 = tpu.matmul %7, %8, %cst {dimension_numbers = #tpu.dot_dimension_numbers<[1], [0], [0], [1], [0, 0, 1, 1], [], []>} : vector<16x100xf32>, vector<100x32xf32>, vector<16x32xf32> -> vector<16x32xf32>
    %c0_5 = arith.constant 0 : index
    %c0_6 = arith.constant 0 : index
    %10 = vector.load %arg3[%c0_5, %c0_6] : memref<16x32xf32, #tpu.memory_space<vmem>>, vector<16x32xf32>
    %11 = arith.addf %9, %10 : vector<16x32xf32>
    %12 = vector.extract_strided_slice %0 {offsets = [0, 0], sizes = [1, 32], strides = [1, 1]} : vector<24x128xf32> to vector<1x32xf32>
    %13 = vector.extract_strided_slice %0 {offsets = [1, 0], sizes = [1, 32], strides = [1, 1]} : vector<24x128xf32> to vector<1x32xf32>
    %cst_7 = arith.constant dense<0.000000e+00> : vector<16xf32>
    %14 = vector.multi_reduction <add>, %11, %cst_7 [1] : vector<16x32xf32> to vector<16xf32>
    %15 = vector.shape_cast %14 : vector<16xf32> to vector<16x1xf32>
    %cst_8 = arith.constant 3.200000e+01 : f32
    %16 = vector.broadcast %cst_8 : f32 to vector<16x1xf32>
    %17 = arith.divf %15, %16 : vector<16x1xf32>
    %18 = vector.broadcast %17 : vector<16x1xf32> to vector<16x32xf32>
    %19 = arith.subf %11, %18 : vector<16x32xf32>
    %20 = arith.mulf %19, %19 : vector<16x32xf32>
    %cst_9 = arith.constant dense<0.000000e+00> : vector<16xf32>
    %21 = vector.multi_reduction <add>, %20, %cst_9 [1] : vector<16x32xf32> to vector<16xf32>
    %22 = vector.shape_cast %21 : vector<16xf32> to vector<16x1xf32>
    %cst_10 = arith.constant 3.200000e+01 : f32
    %23 = vector.broadcast %cst_10 : f32 to vector<16x1xf32>
    %24 = arith.divf %22, %23 : vector<16x1xf32>
    %cst_11 = arith.constant 9.99999996E-13 : f32
    %25 = vector.broadcast %cst_11 : f32 to vector<16x1xf32>
    %26 = arith.addf %24, %25 : vector<16x1xf32>
    %27 = math.rsqrt %26 : vector<16x1xf32>
    %28 = vector.broadcast %27 : vector<16x1xf32> to vector<16x32xf32>
    %29 = arith.mulf %19, %28 : vector<16x32xf32>
    %30 = vector.broadcast %12 : vector<1x32xf32> to vector<16x32xf32>
    %31 = arith.mulf %29, %30 : vector<16x32xf32>
    %32 = vector.broadcast %13 : vector<1x32xf32> to vector<16x32xf32>
    %33 = arith.addf %31, %32 : vector<16x32xf32>
    %c0_12 = arith.constant 0 : index
    %c0_13 = arith.constant 0 : index
    %34 = vector.load %arg1[%c0_12, %c0_13] : memref<2x8xi32, #tpu.memory_space<vmem>>, vector<2x8xi32>
    %35 = vector.extract_strided_slice %34 {offsets = [0, 0], sizes = [1, 8], strides = [1, 1]} : vector<2x8xi32> to vector<1x8xi32>
    %c0_i32 = arith.constant 0 : i32
    %36 = vector.broadcast %c0_i32 : i32 to vector<1x8xi32>
    %37 = arith.cmpi sgt, %35, %36 : vector<1x8xi32>
    %cst_14 = arith.constant 0.000000e+00 : f32
    %cst_15 = arith.constant -3.40282347E+38 : f32
    %38 = vector.broadcast %cst_14 : f32 to vector<1x8xf32>
    %39 = vector.broadcast %cst_15 : f32 to vector<1x8xf32>
    %40 = arith.select %37, %38, %39 : vector<1x8xi1>, vector<1x8xf32>
    %41 = vector.shape_cast %40 : vector<1x8xf32> to vector<1x8xf32>
    %42 = vector.broadcast %41 : vector<1x8xf32> to vector<8x8xf32>
    %cst_16 = arith.constant -3.40282347E+38 : f32
    %43 = vector.broadcast %cst_16 : f32 to vector<8x8xf32>
    %44 = tpu.concatenate %42, %43 in 1 : vector<8x8xf32>, vector<8x8xf32> -> vector<8x16xf32>
    %cst_17 = arith.constant -3.40282347E+38 : f32
    %45 = vector.broadcast %cst_17 : f32 to vector<8x8xf32>
    %46 = vector.extract_strided_slice %34 {offsets = [1, 0], sizes = [1, 8], strides = [1, 1]} : vector<2x8xi32> to vector<1x8xi32>
    %c0_i32_18 = arith.constant 0 : i32
    %47 = vector.broadcast %c0_i32_18 : i32 to vector<1x8xi32>
    %48 = arith.cmpi sgt, %46, %47 : vector<1x8xi32>
    %cst_19 = arith.constant 0.000000e+00 : f32
    %cst_20 = arith.constant -3.40282347E+38 : f32
    %49 = vector.broadcast %cst_19 : f32 to vector<1x8xf32>
    %50 = vector.broadcast %cst_20 : f32 to vector<1x8xf32>
    %51 = arith.select %48, %49, %50 : vector<1x8xi1>, vector<1x8xf32>
    %52 = vector.shape_cast %51 : vector<1x8xf32> to vector<1x8xf32>
    %53 = vector.broadcast %52 : vector<1x8xf32> to vector<8x8xf32>
    %54 = tpu.concatenate %45, %53 in 1 : vector<8x8xf32>, vector<8x8xf32> -> vector<8x16xf32>
    %55 = tpu.concatenate %44, %54 in 0 : vector<8x16xf32>, vector<8x16xf32> -> vector<16x16xf32>
    %c0_21 = arith.constant 0 : index
    %c0_22 = arith.constant 0 : index
    %c0_23 = arith.constant 0 : index
    %56 = vector.load %arg5[%c0_21, %c0_22, %c0_23] : memref<2x32x96xf32, #tpu.memory_space<vmem>>, vector<1x32x96xf32>
    %57 = vector.shape_cast %56 : vector<1x32x96xf32> to vector<32x96xf32>
    %cst_24 = arith.constant dense<0.000000e+00> : vector<16x96xf32>
    %58 = tpu.matmul %33, %57, %cst_24 {dimension_numbers = #tpu.dot_dimension_numbers<[1], [0], [0], [1], [0, 0, 1, 1], [], []>} : vector<16x32xf32>, vector<32x96xf32>, vector<16x96xf32> -> vector<16x96xf32>
    %59 = vector.extract_strided_slice %0 {offsets = [2, 0], sizes = [1, 96], strides = [1, 1]} : vector<24x128xf32> to vector<1x96xf32>
    %60 = vector.broadcast %59 : vector<1x96xf32> to vector<16x96xf32>
    %61 = arith.addf %58, %60 : vector<16x96xf32>
    %62 = vector.extract_strided_slice %61 {offsets = [0, 0], sizes = [16, 8], strides = [1, 1]} : vector<16x96xf32> to vector<16x8xf32>
    %63 = vector.extract_strided_slice %61 {offsets = [0, 32], sizes = [16, 8], strides = [1, 1]} : vector<16x96xf32> to vector<16x8xf32>
    %64 = vector.extract_strided_slice %61 {offsets = [0, 64], sizes = [16, 8], strides = [1, 1]} : vector<16x96xf32> to vector<16x8xf32>
    %cst_25 = arith.constant dense<0.000000e+00> : vector<16x16xf32>
    %65 = tpu.matmul %62, %63, %cst_25 {dimension_numbers = #tpu.dot_dimension_numbers<[1], [1], [0], [0], [0, 0, 1, 0], [], []>} : vector<16x8xf32>, vector<16x8xf32>, vector<16x16xf32> -> vector<16x16xf32>
    %66 = arith.addf %65, %55 : vector<16x16xf32>
    %cst_26 = arith.constant dense<0xFF800000> : vector<16xf32>
    %67 = vector.multi_reduction <maximumf>, %66, %cst_26 [1] : vector<16x16xf32> to vector<16xf32>
    %68 = vector.shape_cast %67 : vector<16xf32> to vector<16x1xf32>
    %69 = vector.broadcast %68 : vector<16x1xf32> to vector<16x16xf32>
    %70 = arith.subf %66, %69 : vector<16x16xf32>
    %71 = math.exp %70 : vector<16x16xf32>
    %cst_27 = arith.constant dense<0.000000e+00> : vector<16xf32>
    %72 = vector.multi_reduction <add>, %71, %cst_27 [1] : vector<16x16xf32> to vector<16xf32>
    %73 = vector.shape_cast %72 : vector<16xf32> to vector<16x1xf32>
    %74 = tpu.reciprocal %73 {approx = true} : vector<16x1xf32> -> vector<16x1xf32>
    %75 = vector.broadcast %74 : vector<16x1xf32> to vector<16x16xf32>
    %76 = arith.mulf %71, %75 : vector<16x16xf32>
    %cst_28 = arith.constant dense<0.000000e+00> : vector<16x8xf32>
    %77 = tpu.matmul %76, %64, %cst_28 {dimension_numbers = #tpu.dot_dimension_numbers<[1], [0], [0], [1], [0, 0, 1, 1], [], []>} : vector<16x16xf32>, vector<16x8xf32>, vector<16x8xf32> -> vector<16x8xf32>
    %78 = vector.extract_strided_slice %61 {offsets = [0, 8], sizes = [16, 8], strides = [1, 1]} : vector<16x96xf32> to vector<16x8xf32>
    %79 = vector.extract_strided_slice %61 {offsets = [0, 40], sizes = [16, 8], strides = [1, 1]} : vector<16x96xf32> to vector<16x8xf32>
    %80 = vector.extract_strided_slice %61 {offsets = [0, 72], sizes = [16, 8], strides = [1, 1]} : vector<16x96xf32> to vector<16x8xf32>
    %cst_29 = arith.constant dense<0.000000e+00> : vector<16x16xf32>
    %81 = tpu.matmul %78, %79, %cst_29 {dimension_numbers = #tpu.dot_dimension_numbers<[1], [1], [0], [0], [0, 0, 1, 0], [], []>} : vector<16x8xf32>, vector<16x8xf32>, vector<16x16xf32> -> vector<16x16xf32>
    %82 = arith.addf %81, %55 : vector<16x16xf32>
    %cst_30 = arith.constant dense<0xFF800000> : vector<16xf32>
    %83 = vector.multi_reduction <maximumf>, %82, %cst_30 [1] : vector<16x16xf32> to vector<16xf32>
    %84 = vector.shape_cast %83 : vector<16xf32> to vector<16x1xf32>
    %85 = vector.broadcast %84 : vector<16x1xf32> to vector<16x16xf32>
    %86 = arith.subf %82, %85 : vector<16x16xf32>
    %87 = math.exp %86 : vector<16x16xf32>
    %cst_31 = arith.constant dense<0.000000e+00> : vector<16xf32>
    %88 = vector.multi_reduction <add>, %87, %cst_31 [1] : vector<16x16xf32> to vector<16xf32>
    %89 = vector.shape_cast %88 : vector<16xf32> to vector<16x1xf32>
    %90 = tpu.reciprocal %89 {approx = true} : vector<16x1xf32> -> vector<16x1xf32>
    %91 = vector.broadcast %90 : vector<16x1xf32> to vector<16x16xf32>
    %92 = arith.mulf %87, %91 : vector<16x16xf32>
    %cst_32 = arith.constant dense<0.000000e+00> : vector<16x8xf32>
    %93 = tpu.matmul %92, %80, %cst_32 {dimension_numbers = #tpu.dot_dimension_numbers<[1], [0], [0], [1], [0, 0, 1, 1], [], []>} : vector<16x16xf32>, vector<16x8xf32>, vector<16x8xf32> -> vector<16x8xf32>
    %94 = vector.extract_strided_slice %61 {offsets = [0, 16], sizes = [16, 8], strides = [1, 1]} : vector<16x96xf32> to vector<16x8xf32>
    %95 = vector.extract_strided_slice %61 {offsets = [0, 48], sizes = [16, 8], strides = [1, 1]} : vector<16x96xf32> to vector<16x8xf32>
    %96 = vector.extract_strided_slice %61 {offsets = [0, 80], sizes = [16, 8], strides = [1, 1]} : vector<16x96xf32> to vector<16x8xf32>
    %cst_33 = arith.constant dense<0.000000e+00> : vector<16x16xf32>
    %97 = tpu.matmul %94, %95, %cst_33 {dimension_numbers = #tpu.dot_dimension_numbers<[1], [1], [0], [0], [0, 0, 1, 0], [], []>} : vector<16x8xf32>, vector<16x8xf32>, vector<16x16xf32> -> vector<16x16xf32>
    %98 = arith.addf %97, %55 : vector<16x16xf32>
    %cst_34 = arith.constant dense<0xFF800000> : vector<16xf32>
    %99 = vector.multi_reduction <maximumf>, %98, %cst_34 [1] : vector<16x16xf32> to vector<16xf32>
    %100 = vector.shape_cast %99 : vector<16xf32> to vector<16x1xf32>
    %101 = vector.broadcast %100 : vector<16x1xf32> to vector<16x16xf32>
    %102 = arith.subf %98, %101 : vector<16x16xf32>
    %103 = math.exp %102 : vector<16x16xf32>
    %cst_35 = arith.constant dense<0.000000e+00> : vector<16xf32>
    %104 = vector.multi_reduction <add>, %103, %cst_35 [1] : vector<16x16xf32> to vector<16xf32>
    %105 = vector.shape_cast %104 : vector<16xf32> to vector<16x1xf32>
    %106 = tpu.reciprocal %105 {approx = true} : vector<16x1xf32> -> vector<16x1xf32>
    %107 = vector.broadcast %106 : vector<16x1xf32> to vector<16x16xf32>
    %108 = arith.mulf %103, %107 : vector<16x16xf32>
    %cst_36 = arith.constant dense<0.000000e+00> : vector<16x8xf32>
    %109 = tpu.matmul %108, %96, %cst_36 {dimension_numbers = #tpu.dot_dimension_numbers<[1], [0], [0], [1], [0, 0, 1, 1], [], []>} : vector<16x16xf32>, vector<16x8xf32>, vector<16x8xf32> -> vector<16x8xf32>
    %110 = vector.extract_strided_slice %61 {offsets = [0, 24], sizes = [16, 8], strides = [1, 1]} : vector<16x96xf32> to vector<16x8xf32>
    %111 = vector.extract_strided_slice %61 {offsets = [0, 56], sizes = [16, 8], strides = [1, 1]} : vector<16x96xf32> to vector<16x8xf32>
    %112 = vector.extract_strided_slice %61 {offsets = [0, 88], sizes = [16, 8], strides = [1, 1]} : vector<16x96xf32> to vector<16x8xf32>
    %cst_37 = arith.constant dense<0.000000e+00> : vector<16x16xf32>
    %113 = tpu.matmul %110, %111, %cst_37 {dimension_numbers = #tpu.dot_dimension_numbers<[1], [1], [0], [0], [0, 0, 1, 0], [], []>} : vector<16x8xf32>, vector<16x8xf32>, vector<16x16xf32> -> vector<16x16xf32>
    %114 = arith.addf %113, %55 : vector<16x16xf32>
    %cst_38 = arith.constant dense<0xFF800000> : vector<16xf32>
    %115 = vector.multi_reduction <maximumf>, %114, %cst_38 [1] : vector<16x16xf32> to vector<16xf32>
    %116 = vector.shape_cast %115 : vector<16xf32> to vector<16x1xf32>
    %117 = vector.broadcast %116 : vector<16x1xf32> to vector<16x16xf32>
    %118 = arith.subf %114, %117 : vector<16x16xf32>
    %119 = math.exp %118 : vector<16x16xf32>
    %cst_39 = arith.constant dense<0.000000e+00> : vector<16xf32>
    %120 = vector.multi_reduction <add>, %119, %cst_39 [1] : vector<16x16xf32> to vector<16xf32>
    %121 = vector.shape_cast %120 : vector<16xf32> to vector<16x1xf32>
    %122 = tpu.reciprocal %121 {approx = true} : vector<16x1xf32> -> vector<16x1xf32>
    %123 = vector.broadcast %122 : vector<16x1xf32> to vector<16x16xf32>
    %124 = arith.mulf %119, %123 : vector<16x16xf32>
    %cst_40 = arith.constant dense<0.000000e+00> : vector<16x8xf32>
    %125 = tpu.matmul %124, %112, %cst_40 {dimension_numbers = #tpu.dot_dimension_numbers<[1], [0], [0], [1], [0, 0, 1, 1], [], []>} : vector<16x16xf32>, vector<16x8xf32>, vector<16x8xf32> -> vector<16x8xf32>
    %126 = tpu.concatenate %77, %93, %109, %125 in 1 : vector<16x8xf32>, vector<16x8xf32>, vector<16x8xf32>, vector<16x8xf32> -> vector<16x32xf32>
    %c0_41 = arith.constant 0 : index
    %c0_42 = arith.constant 0 : index
    %c0_43 = arith.constant 0 : index
    %127 = vector.load %arg6[%c0_41, %c0_42, %c0_43] : memref<2x32x32xf32, #tpu.memory_space<vmem>>, vector<1x32x32xf32>
    %128 = vector.shape_cast %127 : vector<1x32x32xf32> to vector<32x32xf32>
    %cst_44 = arith.constant dense<0.000000e+00> : vector<16x32xf32>
    %129 = tpu.matmul %126, %128, %cst_44 {dimension_numbers = #tpu.dot_dimension_numbers<[1], [0], [0], [1], [0, 0, 1, 1], [], []>} : vector<16x32xf32>, vector<32x32xf32>, vector<16x32xf32> -> vector<16x32xf32>
    %130 = vector.extract_strided_slice %0 {offsets = [3, 0], sizes = [1, 32], strides = [1, 1]} : vector<24x128xf32> to vector<1x32xf32>
    %131 = vector.broadcast %130 : vector<1x32xf32> to vector<16x32xf32>
    %132 = arith.addf %129, %131 : vector<16x32xf32>
    %133 = arith.addf %132, %33 : vector<16x32xf32>
    %134 = vector.extract_strided_slice %0 {offsets = [4, 0], sizes = [1, 32], strides = [1, 1]} : vector<24x128xf32> to vector<1x32xf32>
    %135 = vector.extract_strided_slice %0 {offsets = [5, 0], sizes = [1, 32], strides = [1, 1]} : vector<24x128xf32> to vector<1x32xf32>
    %cst_45 = arith.constant dense<0.000000e+00> : vector<16xf32>
    %136 = vector.multi_reduction <add>, %133, %cst_45 [1] : vector<16x32xf32> to vector<16xf32>
    %137 = vector.shape_cast %136 : vector<16xf32> to vector<16x1xf32>
    %cst_46 = arith.constant 3.200000e+01 : f32
    %138 = vector.broadcast %cst_46 : f32 to vector<16x1xf32>
    %139 = arith.divf %137, %138 : vector<16x1xf32>
    %140 = vector.broadcast %139 : vector<16x1xf32> to vector<16x32xf32>
    %141 = arith.subf %133, %140 : vector<16x32xf32>
    %142 = arith.mulf %141, %141 : vector<16x32xf32>
    %cst_47 = arith.constant dense<0.000000e+00> : vector<16xf32>
    %143 = vector.multi_reduction <add>, %142, %cst_47 [1] : vector<16x32xf32> to vector<16xf32>
    %144 = vector.shape_cast %143 : vector<16xf32> to vector<16x1xf32>
    %cst_48 = arith.constant 3.200000e+01 : f32
    %145 = vector.broadcast %cst_48 : f32 to vector<16x1xf32>
    %146 = arith.divf %144, %145 : vector<16x1xf32>
    %cst_49 = arith.constant 9.99999996E-13 : f32
    %147 = vector.broadcast %cst_49 : f32 to vector<16x1xf32>
    %148 = arith.addf %146, %147 : vector<16x1xf32>
    %149 = math.rsqrt %148 : vector<16x1xf32>
    %150 = vector.broadcast %149 : vector<16x1xf32> to vector<16x32xf32>
    %151 = arith.mulf %141, %150 : vector<16x32xf32>
    %152 = vector.broadcast %134 : vector<1x32xf32> to vector<16x32xf32>
    %153 = arith.mulf %151, %152 : vector<16x32xf32>
    %154 = vector.broadcast %135 : vector<1x32xf32> to vector<16x32xf32>
    %155 = arith.addf %153, %154 : vector<16x32xf32>
    %c0_50 = arith.constant 0 : index
    %c0_51 = arith.constant 0 : index
    %c0_52 = arith.constant 0 : index
    %156 = vector.load %arg7[%c0_50, %c0_51, %c0_52] : memref<2x32x128xf32, #tpu.memory_space<vmem>>, vector<1x32x128xf32>
    %157 = vector.shape_cast %156 : vector<1x32x128xf32> to vector<32x128xf32>
    %cst_53 = arith.constant dense<0.000000e+00> : vector<16x128xf32>
    %158 = tpu.matmul %155, %157, %cst_53 {dimension_numbers = #tpu.dot_dimension_numbers<[1], [0], [0], [1], [0, 0, 1, 1], [], []>} : vector<16x32xf32>, vector<32x128xf32>, vector<16x128xf32> -> vector<16x128xf32>
    %159 = vector.extract_strided_slice %0 {offsets = [6, 0], sizes = [1, 128], strides = [1, 1]} : vector<24x128xf32> to vector<1x128xf32>
    %160 = vector.broadcast %159 : vector<1x128xf32> to vector<16x128xf32>
    %161 = arith.addf %158, %160 : vector<16x128xf32>
    %cst_54 = arith.constant 5.000000e-01 : f32
    %162 = vector.broadcast %cst_54 : f32 to vector<16x128xf32>
    %163 = arith.mulf %162, %161 : vector<16x128xf32>
    %cst_55 = arith.constant 0.707106769 : f32
    %164 = vector.broadcast %cst_55 : f32 to vector<16x128xf32>
    %165 = arith.mulf %161, %164 : vector<16x128xf32>
    %166 = math.absf %165 : vector<16x128xf32>
    %cst_56 = arith.constant 0.327591091 : f32
    %167 = vector.broadcast %cst_56 : f32 to vector<16x128xf32>
    %168 = arith.mulf %167, %166 : vector<16x128xf32>
    %cst_57 = arith.constant 1.000000e+00 : f32
    %169 = vector.broadcast %cst_57 : f32 to vector<16x128xf32>
    %170 = arith.addf %169, %168 : vector<16x128xf32>
    %171 = tpu.reciprocal %170 {approx = true} : vector<16x128xf32> -> vector<16x128xf32>
    %cst_58 = arith.constant 1.06140542 : f32
    %172 = vector.broadcast %cst_58 : f32 to vector<16x128xf32>
    %173 = arith.mulf %171, %172 : vector<16x128xf32>
    %cst_59 = arith.constant -1.45315206 : f32
    %174 = vector.broadcast %cst_59 : f32 to vector<16x128xf32>
    %175 = arith.addf %174, %173 : vector<16x128xf32>
    %176 = arith.mulf %171, %175 : vector<16x128xf32>
    %cst_60 = arith.constant 1.42141378 : f32
    %177 = vector.broadcast %cst_60 : f32 to vector<16x128xf32>
    %178 = arith.addf %177, %176 : vector<16x128xf32>
    %179 = arith.mulf %171, %178 : vector<16x128xf32>
    %cst_61 = arith.constant -0.284496725 : f32
    %180 = vector.broadcast %cst_61 : f32 to vector<16x128xf32>
    %181 = arith.addf %180, %179 : vector<16x128xf32>
    %182 = arith.mulf %171, %181 : vector<16x128xf32>
    %cst_62 = arith.constant 0.254829586 : f32
    %183 = vector.broadcast %cst_62 : f32 to vector<16x128xf32>
    %184 = arith.addf %183, %182 : vector<16x128xf32>
    %185 = arith.mulf %171, %184 : vector<16x128xf32>
    %cst_63 = arith.constant 0.000000e+00 : f32
    %186 = vector.broadcast %cst_63 : f32 to vector<16x128xf32>
    %187 = arith.subf %186, %166 : vector<16x128xf32>
    %188 = arith.mulf %187, %166 : vector<16x128xf32>
    %189 = math.exp %188 : vector<16x128xf32>
    %190 = arith.mulf %185, %189 : vector<16x128xf32>
    %cst_64 = arith.constant 1.000000e+00 : f32
    %191 = vector.broadcast %cst_64 : f32 to vector<16x128xf32>
    %192 = arith.subf %191, %190 : vector<16x128xf32>
    %cst_65 = arith.constant 0.000000e+00 : f32
    %193 = vector.broadcast %cst_65 : f32 to vector<16x128xf32>
    %194 = arith.cmpf olt, %165, %193 : vector<16x128xf32>
    %cst_66 = arith.constant 0.000000e+00 : f32
    %195 = vector.broadcast %cst_66 : f32 to vector<16x128xf32>
    %196 = arith.subf %195, %192 : vector<16x128xf32>
    %197 = arith.select %194, %196, %192 : vector<16x128xi1>, vector<16x128xf32>
    %cst_67 = arith.constant 1.000000e+00 : f32
    %198 = vector.broadcast %cst_67 : f32 to vector<16x128xf32>
    %199 = arith.addf %198, %197 : vector<16x128xf32>
    %200 = arith.mulf %163, %199 : vector<16x128xf32>
    %c0_68 = arith.constant 0 : index
    %c0_69 = arith.constant 0 : index
    %c0_70 = arith.constant 0 : index
    %201 = vector.load %arg8[%c0_68, %c0_69, %c0_70] : memref<2x128x32xf32, #tpu.memory_space<vmem>>, vector<1x128x32xf32>
    %202 = vector.shape_cast %201 : vector<1x128x32xf32> to vector<128x32xf32>
    %cst_71 = arith.constant dense<0.000000e+00> : vector<16x32xf32>
    %203 = tpu.matmul %200, %202, %cst_71 {dimension_numbers = #tpu.dot_dimension_numbers<[1], [0], [0], [1], [0, 0, 1, 1], [], []>} : vector<16x128xf32>, vector<128x32xf32>, vector<16x32xf32> -> vector<16x32xf32>
    %204 = vector.extract_strided_slice %0 {offsets = [7, 0], sizes = [1, 32], strides = [1, 1]} : vector<24x128xf32> to vector<1x32xf32>
    %205 = vector.broadcast %204 : vector<1x32xf32> to vector<16x32xf32>
    %206 = arith.addf %203, %205 : vector<16x32xf32>
    %207 = arith.addf %206, %155 : vector<16x32xf32>
    %208 = vector.extract_strided_slice %0 {offsets = [8, 0], sizes = [1, 32], strides = [1, 1]} : vector<24x128xf32> to vector<1x32xf32>
    %209 = vector.extract_strided_slice %0 {offsets = [9, 0], sizes = [1, 32], strides = [1, 1]} : vector<24x128xf32> to vector<1x32xf32>
    %cst_72 = arith.constant dense<0.000000e+00> : vector<16xf32>
    %210 = vector.multi_reduction <add>, %207, %cst_72 [1] : vector<16x32xf32> to vector<16xf32>
    %211 = vector.shape_cast %210 : vector<16xf32> to vector<16x1xf32>
    %cst_73 = arith.constant 3.200000e+01 : f32
    %212 = vector.broadcast %cst_73 : f32 to vector<16x1xf32>
    %213 = arith.divf %211, %212 : vector<16x1xf32>
    %214 = vector.broadcast %213 : vector<16x1xf32> to vector<16x32xf32>
    %215 = arith.subf %207, %214 : vector<16x32xf32>
    %216 = arith.mulf %215, %215 : vector<16x32xf32>
    %cst_74 = arith.constant dense<0.000000e+00> : vector<16xf32>
    %217 = vector.multi_reduction <add>, %216, %cst_74 [1] : vector<16x32xf32> to vector<16xf32>
    %218 = vector.shape_cast %217 : vector<16xf32> to vector<16x1xf32>
    %cst_75 = arith.constant 3.200000e+01 : f32
    %219 = vector.broadcast %cst_75 : f32 to vector<16x1xf32>
    %220 = arith.divf %218, %219 : vector<16x1xf32>
    %cst_76 = arith.constant 9.99999996E-13 : f32
    %221 = vector.broadcast %cst_76 : f32 to vector<16x1xf32>
    %222 = arith.addf %220, %221 : vector<16x1xf32>
    %223 = math.rsqrt %222 : vector<16x1xf32>
    %224 = vector.broadcast %223 : vector<16x1xf32> to vector<16x32xf32>
    %225 = arith.mulf %215, %224 : vector<16x32xf32>
    %226 = vector.broadcast %208 : vector<1x32xf32> to vector<16x32xf32>
    %227 = arith.mulf %225, %226 : vector<16x32xf32>
    %228 = vector.broadcast %209 : vector<1x32xf32> to vector<16x32xf32>
    %229 = arith.addf %227, %228 : vector<16x32xf32>
    %c1 = arith.constant 1 : index
    %c0_77 = arith.constant 0 : index
    %c0_78 = arith.constant 0 : index
    %230 = vector.load %arg5[%c1, %c0_77, %c0_78] : memref<2x32x96xf32, #tpu.memory_space<vmem>>, vector<1x32x96xf32>
    %231 = vector.shape_cast %230 : vector<1x32x96xf32> to vector<32x96xf32>
    %cst_79 = arith.constant dense<0.000000e+00> : vector<16x96xf32>
    %232 = tpu.matmul %229, %231, %cst_79 {dimension_numbers = #tpu.dot_dimension_numbers<[1], [0], [0], [1], [0, 0, 1, 1], [], []>} : vector<16x32xf32>, vector<32x96xf32>, vector<16x96xf32> -> vector<16x96xf32>
    %233 = vector.extract_strided_slice %0 {offsets = [10, 0], sizes = [1, 96], strides = [1, 1]} : vector<24x128xf32> to vector<1x96xf32>
    %234 = vector.broadcast %233 : vector<1x96xf32> to vector<16x96xf32>
    %235 = arith.addf %232, %234 : vector<16x96xf32>
    %236 = vector.extract_strided_slice %235 {offsets = [0, 0], sizes = [16, 8], strides = [1, 1]} : vector<16x96xf32> to vector<16x8xf32>
    %237 = vector.extract_strided_slice %235 {offsets = [0, 32], sizes = [16, 8], strides = [1, 1]} : vector<16x96xf32> to vector<16x8xf32>
    %238 = vector.extract_strided_slice %235 {offsets = [0, 64], sizes = [16, 8], strides = [1, 1]} : vector<16x96xf32> to vector<16x8xf32>
    %cst_80 = arith.constant dense<0.000000e+00> : vector<16x16xf32>
    %239 = tpu.matmul %236, %237, %cst_80 {dimension_numbers = #tpu.dot_dimension_numbers<[1], [1], [0], [0], [0, 0, 1, 0], [], []>} : vector<16x8xf32>, vector<16x8xf32>, vector<16x16xf32> -> vector<16x16xf32>
    %240 = arith.addf %239, %55 : vector<16x16xf32>
    %cst_81 = arith.constant dense<0xFF800000> : vector<16xf32>
    %241 = vector.multi_reduction <maximumf>, %240, %cst_81 [1] : vector<16x16xf32> to vector<16xf32>
    %242 = vector.shape_cast %241 : vector<16xf32> to vector<16x1xf32>
    %243 = vector.broadcast %242 : vector<16x1xf32> to vector<16x16xf32>
    %244 = arith.subf %240, %243 : vector<16x16xf32>
    %245 = math.exp %244 : vector<16x16xf32>
    %cst_82 = arith.constant dense<0.000000e+00> : vector<16xf32>
    %246 = vector.multi_reduction <add>, %245, %cst_82 [1] : vector<16x16xf32> to vector<16xf32>
    %247 = vector.shape_cast %246 : vector<16xf32> to vector<16x1xf32>
    %248 = tpu.reciprocal %247 {approx = true} : vector<16x1xf32> -> vector<16x1xf32>
    %249 = vector.broadcast %248 : vector<16x1xf32> to vector<16x16xf32>
    %250 = arith.mulf %245, %249 : vector<16x16xf32>
    %cst_83 = arith.constant dense<0.000000e+00> : vector<16x8xf32>
    %251 = tpu.matmul %250, %238, %cst_83 {dimension_numbers = #tpu.dot_dimension_numbers<[1], [0], [0], [1], [0, 0, 1, 1], [], []>} : vector<16x16xf32>, vector<16x8xf32>, vector<16x8xf32> -> vector<16x8xf32>
    %252 = vector.extract_strided_slice %235 {offsets = [0, 8], sizes = [16, 8], strides = [1, 1]} : vector<16x96xf32> to vector<16x8xf32>
    %253 = vector.extract_strided_slice %235 {offsets = [0, 40], sizes = [16, 8], strides = [1, 1]} : vector<16x96xf32> to vector<16x8xf32>
    %254 = vector.extract_strided_slice %235 {offsets = [0, 72], sizes = [16, 8], strides = [1, 1]} : vector<16x96xf32> to vector<16x8xf32>
    %cst_84 = arith.constant dense<0.000000e+00> : vector<16x16xf32>
    %255 = tpu.matmul %252, %253, %cst_84 {dimension_numbers = #tpu.dot_dimension_numbers<[1], [1], [0], [0], [0, 0, 1, 0], [], []>} : vector<16x8xf32>, vector<16x8xf32>, vector<16x16xf32> -> vector<16x16xf32>
    %256 = arith.addf %255, %55 : vector<16x16xf32>
    %cst_85 = arith.constant dense<0xFF800000> : vector<16xf32>
    %257 = vector.multi_reduction <maximumf>, %256, %cst_85 [1] : vector<16x16xf32> to vector<16xf32>
    %258 = vector.shape_cast %257 : vector<16xf32> to vector<16x1xf32>
    %259 = vector.broadcast %258 : vector<16x1xf32> to vector<16x16xf32>
    %260 = arith.subf %256, %259 : vector<16x16xf32>
    %261 = math.exp %260 : vector<16x16xf32>
    %cst_86 = arith.constant dense<0.000000e+00> : vector<16xf32>
    %262 = vector.multi_reduction <add>, %261, %cst_86 [1] : vector<16x16xf32> to vector<16xf32>
    %263 = vector.shape_cast %262 : vector<16xf32> to vector<16x1xf32>
    %264 = tpu.reciprocal %263 {approx = true} : vector<16x1xf32> -> vector<16x1xf32>
    %265 = vector.broadcast %264 : vector<16x1xf32> to vector<16x16xf32>
    %266 = arith.mulf %261, %265 : vector<16x16xf32>
    %cst_87 = arith.constant dense<0.000000e+00> : vector<16x8xf32>
    %267 = tpu.matmul %266, %254, %cst_87 {dimension_numbers = #tpu.dot_dimension_numbers<[1], [0], [0], [1], [0, 0, 1, 1], [], []>} : vector<16x16xf32>, vector<16x8xf32>, vector<16x8xf32> -> vector<16x8xf32>
    %268 = vector.extract_strided_slice %235 {offsets = [0, 16], sizes = [16, 8], strides = [1, 1]} : vector<16x96xf32> to vector<16x8xf32>
    %269 = vector.extract_strided_slice %235 {offsets = [0, 48], sizes = [16, 8], strides = [1, 1]} : vector<16x96xf32> to vector<16x8xf32>
    %270 = vector.extract_strided_slice %235 {offsets = [0, 80], sizes = [16, 8], strides = [1, 1]} : vector<16x96xf32> to vector<16x8xf32>
    %cst_88 = arith.constant dense<0.000000e+00> : vector<16x16xf32>
    %271 = tpu.matmul %268, %269, %cst_88 {dimension_numbers = #tpu.dot_dimension_numbers<[1], [1], [0], [0], [0, 0, 1, 0], [], []>} : vector<16x8xf32>, vector<16x8xf32>, vector<16x16xf32> -> vector<16x16xf32>
    %272 = arith.addf %271, %55 : vector<16x16xf32>
    %cst_89 = arith.constant dense<0xFF800000> : vector<16xf32>
    %273 = vector.multi_reduction <maximumf>, %272, %cst_89 [1] : vector<16x16xf32> to vector<16xf32>
    %274 = vector.shape_cast %273 : vector<16xf32> to vector<16x1xf32>
    %275 = vector.broadcast %274 : vector<16x1xf32> to vector<16x16xf32>
    %276 = arith.subf %272, %275 : vector<16x16xf32>
    %277 = math.exp %276 : vector<16x16xf32>
    %cst_90 = arith.constant dense<0.000000e+00> : vector<16xf32>
    %278 = vector.multi_reduction <add>, %277, %cst_90 [1] : vector<16x16xf32> to vector<16xf32>
    %279 = vector.shape_cast %278 : vector<16xf32> to vector<16x1xf32>
    %280 = tpu.reciprocal %279 {approx = true} : vector<16x1xf32> -> vector<16x1xf32>
    %281 = vector.broadcast %280 : vector<16x1xf32> to vector<16x16xf32>
    %282 = arith.mulf %277, %281 : vector<16x16xf32>
    %cst_91 = arith.constant dense<0.000000e+00> : vector<16x8xf32>
    %283 = tpu.matmul %282, %270, %cst_91 {dimension_numbers = #tpu.dot_dimension_numbers<[1], [0], [0], [1], [0, 0, 1, 1], [], []>} : vector<16x16xf32>, vector<16x8xf32>, vector<16x8xf32> -> vector<16x8xf32>
    %284 = vector.extract_strided_slice %235 {offsets = [0, 24], sizes = [16, 8], strides = [1, 1]} : vector<16x96xf32> to vector<16x8xf32>
    %285 = vector.extract_strided_slice %235 {offsets = [0, 56], sizes = [16, 8], strides = [1, 1]} : vector<16x96xf32> to vector<16x8xf32>
    %286 = vector.extract_strided_slice %235 {offsets = [0, 88], sizes = [16, 8], strides = [1, 1]} : vector<16x96xf32> to vector<16x8xf32>
    %cst_92 = arith.constant dense<0.000000e+00> : vector<16x16xf32>
    %287 = tpu.matmul %284, %285, %cst_92 {dimension_numbers = #tpu.dot_dimension_numbers<[1], [1], [0], [0], [0, 0, 1, 0], [], []>} : vector<16x8xf32>, vector<16x8xf32>, vector<16x16xf32> -> vector<16x16xf32>
    %288 = arith.addf %287, %55 : vector<16x16xf32>
    %cst_93 = arith.constant dense<0xFF800000> : vector<16xf32>
    %289 = vector.multi_reduction <maximumf>, %288, %cst_93 [1] : vector<16x16xf32> to vector<16xf32>
    %290 = vector.shape_cast %289 : vector<16xf32> to vector<16x1xf32>
    %291 = vector.broadcast %290 : vector<16x1xf32> to vector<16x16xf32>
    %292 = arith.subf %288, %291 : vector<16x16xf32>
    %293 = math.exp %292 : vector<16x16xf32>
    %cst_94 = arith.constant dense<0.000000e+00> : vector<16xf32>
    %294 = vector.multi_reduction <add>, %293, %cst_94 [1] : vector<16x16xf32> to vector<16xf32>
    %295 = vector.shape_cast %294 : vector<16xf32> to vector<16x1xf32>
    %296 = tpu.reciprocal %295 {approx = true} : vector<16x1xf32> -> vector<16x1xf32>
    %297 = vector.broadcast %296 : vector<16x1xf32> to vector<16x16xf32>
    %298 = arith.mulf %293, %297 : vector<16x16xf32>
    %cst_95 = arith.constant dense<0.000000e+00> : vector<16x8xf32>
    %299 = tpu.matmul %298, %286, %cst_95 {dimension_numbers = #tpu.dot_dimension_numbers<[1], [0], [0], [1], [0, 0, 1, 1], [], []>} : vector<16x16xf32>, vector<16x8xf32>, vector<16x8xf32> -> vector<16x8xf32>
    %300 = tpu.concatenate %251, %267, %283, %299 in 1 : vector<16x8xf32>, vector<16x8xf32>, vector<16x8xf32>, vector<16x8xf32> -> vector<16x32xf32>
    %c1_96 = arith.constant 1 : index
    %c0_97 = arith.constant 0 : index
    %c0_98 = arith.constant 0 : index
    %301 = vector.load %arg6[%c1_96, %c0_97, %c0_98] : memref<2x32x32xf32, #tpu.memory_space<vmem>>, vector<1x32x32xf32>
    %302 = vector.shape_cast %301 : vector<1x32x32xf32> to vector<32x32xf32>
    %cst_99 = arith.constant dense<0.000000e+00> : vector<16x32xf32>
    %303 = tpu.matmul %300, %302, %cst_99 {dimension_numbers = #tpu.dot_dimension_numbers<[1], [0], [0], [1], [0, 0, 1, 1], [], []>} : vector<16x32xf32>, vector<32x32xf32>, vector<16x32xf32> -> vector<16x32xf32>
    %304 = vector.extract_strided_slice %0 {offsets = [11, 0], sizes = [1, 32], strides = [1, 1]} : vector<24x128xf32> to vector<1x32xf32>
    %305 = vector.broadcast %304 : vector<1x32xf32> to vector<16x32xf32>
    %306 = arith.addf %303, %305 : vector<16x32xf32>
    %307 = arith.addf %306, %229 : vector<16x32xf32>
    %308 = vector.extract_strided_slice %0 {offsets = [12, 0], sizes = [1, 32], strides = [1, 1]} : vector<24x128xf32> to vector<1x32xf32>
    %309 = vector.extract_strided_slice %0 {offsets = [13, 0], sizes = [1, 32], strides = [1, 1]} : vector<24x128xf32> to vector<1x32xf32>
    %cst_100 = arith.constant dense<0.000000e+00> : vector<16xf32>
    %310 = vector.multi_reduction <add>, %307, %cst_100 [1] : vector<16x32xf32> to vector<16xf32>
    %311 = vector.shape_cast %310 : vector<16xf32> to vector<16x1xf32>
    %cst_101 = arith.constant 3.200000e+01 : f32
    %312 = vector.broadcast %cst_101 : f32 to vector<16x1xf32>
    %313 = arith.divf %311, %312 : vector<16x1xf32>
    %314 = vector.broadcast %313 : vector<16x1xf32> to vector<16x32xf32>
    %315 = arith.subf %307, %314 : vector<16x32xf32>
    %316 = arith.mulf %315, %315 : vector<16x32xf32>
    %cst_102 = arith.constant dense<0.000000e+00> : vector<16xf32>
    %317 = vector.multi_reduction <add>, %316, %cst_102 [1] : vector<16x32xf32> to vector<16xf32>
    %318 = vector.shape_cast %317 : vector<16xf32> to vector<16x1xf32>
    %cst_103 = arith.constant 3.200000e+01 : f32
    %319 = vector.broadcast %cst_103 : f32 to vector<16x1xf32>
    %320 = arith.divf %318, %319 : vector<16x1xf32>
    %cst_104 = arith.constant 9.99999996E-13 : f32
    %321 = vector.broadcast %cst_104 : f32 to vector<16x1xf32>
    %322 = arith.addf %320, %321 : vector<16x1xf32>
    %323 = math.rsqrt %322 : vector<16x1xf32>
    %324 = vector.broadcast %323 : vector<16x1xf32> to vector<16x32xf32>
    %325 = arith.mulf %315, %324 : vector<16x32xf32>
    %326 = vector.broadcast %308 : vector<1x32xf32> to vector<16x32xf32>
    %327 = arith.mulf %325, %326 : vector<16x32xf32>
    %328 = vector.broadcast %309 : vector<1x32xf32> to vector<16x32xf32>
    %329 = arith.addf %327, %328 : vector<16x32xf32>
    %c1_105 = arith.constant 1 : index
    %c0_106 = arith.constant 0 : index
    %c0_107 = arith.constant 0 : index
    %330 = vector.load %arg7[%c1_105, %c0_106, %c0_107] : memref<2x32x128xf32, #tpu.memory_space<vmem>>, vector<1x32x128xf32>
    %331 = vector.shape_cast %330 : vector<1x32x128xf32> to vector<32x128xf32>
    %cst_108 = arith.constant dense<0.000000e+00> : vector<16x128xf32>
    %332 = tpu.matmul %329, %331, %cst_108 {dimension_numbers = #tpu.dot_dimension_numbers<[1], [0], [0], [1], [0, 0, 1, 1], [], []>} : vector<16x32xf32>, vector<32x128xf32>, vector<16x128xf32> -> vector<16x128xf32>
    %333 = vector.extract_strided_slice %0 {offsets = [14, 0], sizes = [1, 128], strides = [1, 1]} : vector<24x128xf32> to vector<1x128xf32>
    %334 = vector.broadcast %333 : vector<1x128xf32> to vector<16x128xf32>
    %335 = arith.addf %332, %334 : vector<16x128xf32>
    %cst_109 = arith.constant 5.000000e-01 : f32
    %336 = vector.broadcast %cst_109 : f32 to vector<16x128xf32>
    %337 = arith.mulf %336, %335 : vector<16x128xf32>
    %cst_110 = arith.constant 0.707106769 : f32
    %338 = vector.broadcast %cst_110 : f32 to vector<16x128xf32>
    %339 = arith.mulf %335, %338 : vector<16x128xf32>
    %340 = math.absf %339 : vector<16x128xf32>
    %cst_111 = arith.constant 0.327591091 : f32
    %341 = vector.broadcast %cst_111 : f32 to vector<16x128xf32>
    %342 = arith.mulf %341, %340 : vector<16x128xf32>
    %cst_112 = arith.constant 1.000000e+00 : f32
    %343 = vector.broadcast %cst_112 : f32 to vector<16x128xf32>
    %344 = arith.addf %343, %342 : vector<16x128xf32>
    %345 = tpu.reciprocal %344 {approx = true} : vector<16x128xf32> -> vector<16x128xf32>
    %cst_113 = arith.constant 1.06140542 : f32
    %346 = vector.broadcast %cst_113 : f32 to vector<16x128xf32>
    %347 = arith.mulf %345, %346 : vector<16x128xf32>
    %cst_114 = arith.constant -1.45315206 : f32
    %348 = vector.broadcast %cst_114 : f32 to vector<16x128xf32>
    %349 = arith.addf %348, %347 : vector<16x128xf32>
    %350 = arith.mulf %345, %349 : vector<16x128xf32>
    %cst_115 = arith.constant 1.42141378 : f32
    %351 = vector.broadcast %cst_115 : f32 to vector<16x128xf32>
    %352 = arith.addf %351, %350 : vector<16x128xf32>
    %353 = arith.mulf %345, %352 : vector<16x128xf32>
    %cst_116 = arith.constant -0.284496725 : f32
    %354 = vector.broadcast %cst_116 : f32 to vector<16x128xf32>
    %355 = arith.addf %354, %353 : vector<16x128xf32>
    %356 = arith.mulf %345, %355 : vector<16x128xf32>
    %cst_117 = arith.constant 0.254829586 : f32
    %357 = vector.broadcast %cst_117 : f32 to vector<16x128xf32>
    %358 = arith.addf %357, %356 : vector<16x128xf32>
    %359 = arith.mulf %345, %358 : vector<16x128xf32>
    %cst_118 = arith.constant 0.000000e+00 : f32
    %360 = vector.broadcast %cst_118 : f32 to vector<16x128xf32>
    %361 = arith.subf %360, %340 : vector<16x128xf32>
    %362 = arith.mulf %361, %340 : vector<16x128xf32>
    %363 = math.exp %362 : vector<16x128xf32>
    %364 = arith.mulf %359, %363 : vector<16x128xf32>
    %cst_119 = arith.constant 1.000000e+00 : f32
    %365 = vector.broadcast %cst_119 : f32 to vector<16x128xf32>
    %366 = arith.subf %365, %364 : vector<16x128xf32>
    %cst_120 = arith.constant 0.000000e+00 : f32
    %367 = vector.broadcast %cst_120 : f32 to vector<16x128xf32>
    %368 = arith.cmpf olt, %339, %367 : vector<16x128xf32>
    %cst_121 = arith.constant 0.000000e+00 : f32
    %369 = vector.broadcast %cst_121 : f32 to vector<16x128xf32>
    %370 = arith.subf %369, %366 : vector<16x128xf32>
    %371 = arith.select %368, %370, %366 : vector<16x128xi1>, vector<16x128xf32>
    %cst_122 = arith.constant 1.000000e+00 : f32
    %372 = vector.broadcast %cst_122 : f32 to vector<16x128xf32>
    %373 = arith.addf %372, %371 : vector<16x128xf32>
    %374 = arith.mulf %337, %373 : vector<16x128xf32>
    %c1_123 = arith.constant 1 : index
    %c0_124 = arith.constant 0 : index
    %c0_125 = arith.constant 0 : index
    %375 = vector.load %arg8[%c1_123, %c0_124, %c0_125] : memref<2x128x32xf32, #tpu.memory_space<vmem>>, vector<1x128x32xf32>
    %376 = vector.shape_cast %375 : vector<1x128x32xf32> to vector<128x32xf32>
    %cst_126 = arith.constant dense<0.000000e+00> : vector<16x32xf32>
    %377 = tpu.matmul %374, %376, %cst_126 {dimension_numbers = #tpu.dot_dimension_numbers<[1], [0], [0], [1], [0, 0, 1, 1], [], []>} : vector<16x128xf32>, vector<128x32xf32>, vector<16x32xf32> -> vector<16x32xf32>
    %378 = vector.extract_strided_slice %0 {offsets = [15, 0], sizes = [1, 32], strides = [1, 1]} : vector<24x128xf32> to vector<1x32xf32>
    %379 = vector.broadcast %378 : vector<1x32xf32> to vector<16x32xf32>
    %380 = arith.addf %377, %379 : vector<16x32xf32>
    %381 = arith.addf %380, %329 : vector<16x32xf32>
    %382 = vector.extract_strided_slice %0 {offsets = [16, 0], sizes = [1, 32], strides = [1, 1]} : vector<24x128xf32> to vector<1x32xf32>
    %383 = vector.extract_strided_slice %0 {offsets = [17, 0], sizes = [1, 32], strides = [1, 1]} : vector<24x128xf32> to vector<1x32xf32>
    %cst_127 = arith.constant dense<0.000000e+00> : vector<16xf32>
    %384 = vector.multi_reduction <add>, %381, %cst_127 [1] : vector<16x32xf32> to vector<16xf32>
    %385 = vector.shape_cast %384 : vector<16xf32> to vector<16x1xf32>
    %cst_128 = arith.constant 3.200000e+01 : f32
    %386 = vector.broadcast %cst_128 : f32 to vector<16x1xf32>
    %387 = arith.divf %385, %386 : vector<16x1xf32>
    %388 = vector.broadcast %387 : vector<16x1xf32> to vector<16x32xf32>
    %389 = arith.subf %381, %388 : vector<16x32xf32>
    %390 = arith.mulf %389, %389 : vector<16x32xf32>
    %cst_129 = arith.constant dense<0.000000e+00> : vector<16xf32>
    %391 = vector.multi_reduction <add>, %390, %cst_129 [1] : vector<16x32xf32> to vector<16xf32>
    %392 = vector.shape_cast %391 : vector<16xf32> to vector<16x1xf32>
    %cst_130 = arith.constant 3.200000e+01 : f32
    %393 = vector.broadcast %cst_130 : f32 to vector<16x1xf32>
    %394 = arith.divf %392, %393 : vector<16x1xf32>
    %cst_131 = arith.constant 9.99999996E-13 : f32
    %395 = vector.broadcast %cst_131 : f32 to vector<16x1xf32>
    %396 = arith.addf %394, %395 : vector<16x1xf32>
    %397 = math.rsqrt %396 : vector<16x1xf32>
    %398 = vector.broadcast %397 : vector<16x1xf32> to vector<16x32xf32>
    %399 = arith.mulf %389, %398 : vector<16x32xf32>
    %400 = vector.broadcast %382 : vector<1x32xf32> to vector<16x32xf32>
    %401 = arith.mulf %399, %400 : vector<16x32xf32>
    %402 = vector.broadcast %383 : vector<1x32xf32> to vector<16x32xf32>
    %403 = arith.addf %401, %402 : vector<16x32xf32>
    %404 = vector.extract_strided_slice %403 {offsets = [0, 0], sizes = [8, 32], strides = [1, 1]} : vector<16x32xf32> to vector<8x32xf32>
    %cst_132 = arith.constant dense<0.000000e+00> : vector<32xf32>
    %405 = vector.multi_reduction <add>, %404, %cst_132 [0] : vector<8x32xf32> to vector<32xf32>
    %406 = vector.shape_cast %405 : vector<32xf32> to vector<1x32xf32>
    %cst_133 = arith.constant 8.000000e+00 : f32
    %407 = vector.broadcast %cst_133 : f32 to vector<1x32xf32>
    %408 = arith.divf %406, %407 : vector<1x32xf32>
    %409 = vector.extract_strided_slice %403 {offsets = [8, 0], sizes = [8, 32], strides = [1, 1]} : vector<16x32xf32> to vector<8x32xf32>
    %cst_134 = arith.constant dense<0.000000e+00> : vector<32xf32>
    %410 = vector.multi_reduction <add>, %409, %cst_134 [0] : vector<8x32xf32> to vector<32xf32>
    %411 = vector.shape_cast %410 : vector<32xf32> to vector<1x32xf32>
    %cst_135 = arith.constant 8.000000e+00 : f32
    %412 = vector.broadcast %cst_135 : f32 to vector<1x32xf32>
    %413 = arith.divf %411, %412 : vector<1x32xf32>
    %414 = tpu.concatenate %408, %413 in 0 : vector<1x32xf32>, vector<1x32xf32> -> vector<2x32xf32>
    %c0_136 = arith.constant 0 : index
    %c0_137 = arith.constant 0 : index
    %415 = vector.load %arg9[%c0_136, %c0_137] : memref<32x128xf32, #tpu.memory_space<vmem>>, vector<32x128xf32>
    %cst_138 = arith.constant dense<0.000000e+00> : vector<2x128xf32>
    %416 = tpu.matmul %414, %415, %cst_138 {dimension_numbers = #tpu.dot_dimension_numbers<[1], [0], [0], [1], [0, 0, 1, 1], [], []>} : vector<2x32xf32>, vector<32x128xf32>, vector<2x128xf32> -> vector<2x128xf32>
    %417 = vector.extract_strided_slice %0 {offsets = [18, 0], sizes = [1, 128], strides = [1, 1]} : vector<24x128xf32> to vector<1x128xf32>
    %418 = vector.broadcast %417 : vector<1x128xf32> to vector<2x128xf32>
    %419 = arith.addf %416, %418 : vector<2x128xf32>
    %c0_139 = arith.constant 0 : index
    %c0_140 = arith.constant 0 : index
    %420 = vector.load %arg10[%c0_139, %c0_140] : memref<2x128xf32, #tpu.memory_space<vmem>>, vector<2x128xf32>
    tpu.vector_store %arg10[%c0_139, %c0_140], %419 {strides = array<i32>} : memref<2x128xf32, #tpu.memory_space<vmem>>, vector<2x128xf32>,
    return
  }
}

</mosaic_0001>

<bundles_post_ra>
// kernel: model_forward.1
= control target key start
LH: loop header
LB: loop body
LE: loop exit
PB: predicated region body
PF: predicated region fallthrough
CT: control target
= control target key end

     0   :  { %v3964_v2 = vmov 0   ;;  %s4668_s0 = inlined_call_operand.vmem [shape: s32[16,1], index: 0, kind: input, shape index: {}]   ;;  %s4669_s1 = inlined_call_operand.vmem [shape: s32[2,8], index: 1, kind: input, shape index: {}]   ;;  %s4670_s2 = inlined_call_operand.vmem [shape: f32[100,32], index: 2, kind: input, shape index: {}]   ;;  %s4671_s3 = inlined_call_operand.vmem [shape: f32[16,32], index: 3, kind: input, shape index: {}]   ;;  %s4672_s4 = inlined_call_operand.vmem [shape: f32[24,128], index: 4, kind: input, shape index: {}]   ;;  %s4673_s5 = inlined_call_operand.vmem [shape: f32[2,32,96], index: 5, kind: input, shape index: {}]   ;;  %s4674_s6 = inlined_call_operand.vmem [shape: f32[2,32,32], index: 6, kind: input, shape index: {}]   ;;  %s4675_s7 = inlined_call_operand.vmem [shape: f32[2,32,128], index: 7, kind: input, shape index: {}]   ;;  %s4676_s8 = inlined_call_operand.vmem [shape: f32[2,128,32], index: 8, kind: input, shape index: {}]   ;;  %s4677_s9 = inlined_call_operand.vmem [shape: f32[32,128], index: 9, kind: input, shape index: {}]   ;;  %s4678_s10 = inlined_call_operand.hbm [shape: f32[2,128], index: 10, kind: output, shape index: {}]  }
   0x1   :  { %v41_v0 = vld [vmem:[%s4668_s0] sm:$0xff]  ;;  %3759 = vset.pattern.permute.xlu0 %v3964_v2  ;;  %v56_v3 = vld [vmem:[%s4670_s2 + $0x8] sm:$0xff]  ;;  %v57_v4 = vld [vmem:[%s4670_s2 + $0x10] sm:$0xff] }
   0x2   :  { %v55_v1 = vld [vmem:[%s4670_s2] sm:$0xff]  ;;  %v58_v5 = vld [vmem:[%s4670_s2 + $0x18] sm:$0xff]  ;;  %44 = vperm.xlu0 %3759, %v41_v0   ;;  %v42_v8 = vld [vmem:[%s4668_s0 + $0x8] sm:$0xff] }
   0x3   :  { %v3517_v6 = vpack.c.bf16 %v56_v3, %v55_v1  ;;  %v3521_v7 = vpack.c.bf16 %v58_v5, %v57_v4  ;;  %v59_v9 = vld [vmem:[%s4670_s2 + $0x20] sm:$0xff]  ;;  %v60_v10 = vld [vmem:[%s4670_s2 + $0x28] sm:$0xff] }
   0x5   :  { %3518 = vmatprep.subr.bf16.mxu0 %v3517_v6 }
   0x6   :  { %15 = vsyncpa [#allocation3], 0  ;;  %3520 = vmatpush3.bf16.msra.mxu0 %v3517_v6  ;;  %47 = vperm.xlu0 %3759, %v42_v8   ;;  %v3525_v11 = vpack.c.bf16 %v60_v10, %v59_v9  ;;  %v61_v12 = vld [vmem:[%s4670_s2 + $0x30] sm:$0xff]  ;;  %v62_v13 = vld [vmem:[%s4670_s2 + $0x38] sm:$0xff]  ;;  %vm77_vm0 = vcmask 1043456   ;;  %v39_v22 = vlaneseq  ;;  %vm70_vm1 = vcmask 818176  }
   0x7   :  { %3522 = vmatprep.subr.bf16.mxu0 %v3521_v7  ;;  %v3529_v14 = vpack.c.bf16 %v62_v13, %v61_v12  ;;  %v63_v15 = vld [vmem:[%s4670_s2 + $0x40] sm:$0xff]  ;;  %v64_v16 = vld [vmem:[%s4670_s2 + $0x48] sm:$0xff]  ;;  %v65_v18 = vld [vmem:[%s4670_s2 + $0x50] sm:$0xff]  ;;  %v3965_v25 = vmov 0.0   ;;  %vm156_vm4 = vcmask 261120   ;;  %vm203_vm5 = vcmask 64512  }
   0x8   :  { %v3533_v17 = vpack.c.bf16 %v64_v16, %v63_v15  ;;  %v66_v19 = vld [vmem:[%s4670_s2 + $0x58] sm:$0xff]  ;;  %v67_v21 = vld [vmem:[%s4670_s2 + $0x60] sm:$0xf]  ;;  %v40_v23 = vand.u32 127, %v39_v22  ;;  %v69_v31 = vld [vmem:[%s4671_s3 + $0x8] sm:$0xff]  ;;  %v4108_v58 = vshrl.u32 %v39_v22, 7 }
   0x9   :  { %v3537_v20 = vpack.c.bf16 %v66_v19, %v65_v18  ;;  %v68_v29 = vld [vmem:[%s4671_s3] sm:$0xff]  ;;  %v215_v48 = vld [vmem:[%s4673_s5 + $0x8] sm:$0xff]  ;;  %v216_v50 = vld [vmem:[%s4673_s5 + $0x10] sm:$0xff]  ;;  %s3966_s13 = smov 120   ;;  %s3967_s14 = smov 96   ;;  %vm392_vm8 = vcmask 130048  }
   0xa   :  { %3524 = vmatpush3.bf16.msra.mxu0 %v3521_v7  ;;  %v214_v47 = vld [vmem:[%s4673_s5] sm:$0xff]  ;;  %v217_v51 = vld [vmem:[%s4673_s5 + $0x18] sm:$0xff]  ;;  %v4111_v60 = vsub.s32 0, %v4108_v58  ;;  %v4119_v62 = vsub.s32 1, %v4108_v58  ;;  %v4134_v9 = vsub.s32 2, %v4108_v58  ;;  %s3968_s15 = smov 88   ;;  %vm4169_vm7 = vmpackc.low %vm203_vm5, %vm203_vm5 }
   0xb   :  { %3526 = vmatprep.subr.bf16.mxu0 %v3525_v11  ;;  %v3541_v49 = vpack.c.bf16 %v215_v48, %v214_v47  ;;  %v3545_v52 = vpack.c.bf16 %v217_v51, %v216_v50  ;;  %v4116_v61 = vld [vmem:[%s4672_s4] sm:$0xff]  ;;  %s3969_s16 = smov 80   ;;  %s3970_s19 = smov 112   ;;  %vm1130_vm9 = vcmask 195584   ;;  %vm3982_vm14 = vmmov 0  }
   0xc   :  { %v187_v63 = vrot.slane %v4116_v61, %v4111_v60  ;;  %v193_v2 = vrot.slane %v4116_v61, %v4119_v62  ;;  %v221_v10 = vrot.slane %v4116_v61, %v4134_v9  ;;  %v196_v16 = vld [vmem:[%s4669_s1] sm:$0x3]  ;;  %s3972_s20 = smov 8   ;;  %s3973_s1 = smov 64   ;;  %vm2881_vm15 = vcmask 1040384  }
   0xd   :  { %vm197_vm6 = vcmp.gt.s32.totalorder %v196_v16, 0  ;;  %s3974_s21 = smov 48   ;;  %s3975_s22 = smov 72  }
   0xe   :  { %3528 = vmatpush3.bf16.msra.mxu0 %v3525_v11  ;;  %s3976_s2 = smov 56   ;;  %s3977_s23 = smov 104  }
   0xf   :  { %3530 = vmatprep.subr.bf16.mxu0 %v3529_v14  ;;  %s3978_s24 = smov 40   ;;  %s3979_s3 = smov 16  }
  0x10   :  { %s3980_s12 = smov 24  }
  0x12   :  { %3532 = vmatpush3.bf16.msra.mxu0 %v3529_v14 }
  0x13   :  { %3534 = vmatprep.subr.bf16.mxu0 %v3533_v17 }
  0x16   :  { %3536 = vmatpush3.bf16.msra.mxu0 %v3533_v17  ;;  %v3971_v17 = vmov -3.4028235e+38  }
  0x17   :  { %3538 = vmatprep.subr.bf16.mxu0 %v3537_v20  ;;  %v198_v18 = vsel %vm197_vm6, 0.0, %v3971_v17 }
  0x18   :  { %v208_v19 = vrot.slane %v198_v18, %v4119_v62 }
  0x1a   :  { %3540 = vmatpush3.bf16.msra.mxu0 %v3537_v20 }
  0x1b   :  { %3253 = vmatprep.subr.msk.mxu0 %vm77_vm0, %v67_v21 }
  0x1e   :  { %3254 = vmatpush3.msk.msra.mxu0 %vm77_vm0, %v67_v21 }
  0x1f   :  { %3542 = vmatprep.subr.bf16.mxu0 %v3541_v49 }
  0x81   :  { %v45_v24 = vpop.permute.xlu0 %44 }
  0x82   :  { %vm49_vm2 = vcmp.eq.s32.totalorder %v45_v24, %v40_v23 }
  0x83   :  { %v2979_v26 = vsel %vm49_vm2, 1.0, %v3965_v25 }
  0x84   :  { %3255 = vmatprep.mubr.msk.f32.mxu0 %vm70_vm1, %v2979_v26 }
  0x85   :  { %v48_v27 = vpop.permute.xlu0 %47 }
  0x86   :  { %vm50_vm3 = vcmp.eq.s32.totalorder %v48_v27, %v40_v23 }
  0x87   :  { %v2980_v28 = vsel %vm50_vm3, 1.0, %v3965_v25 }
  0x88   :  { %3256 = vmatmul.mubr.msk.f32.vlgmr.msra.gmra.mrb[0].mxu0 %vm70_vm1, %v2980_v28 }
  0x89   :  { %3544 = vmatpush3.bf16.msra.mxu0 %v3541_v49 }
  0x8a   :  { %3546 = vmatprep.subr.bf16.mxu0 %v3545_v52 }
  0x8d   :  { %3548 = vmatpush3.bf16.msra.mxu0 %v3545_v52 }
 0x15b   :  { %v3257_v30 = vpop.f32.mrb[0].mxu0 }
 0x15c   :  { %v147_v32 = vpop.f32.mrb[1].mxu0  ;;  %v153_v34 = vadd.f32 %v3257_v30, %v69_v31 }
 0x15d   :  { %v148_v33 = vadd.f32 %v147_v32, %v68_v29 }
 0x15e   :  { %v160_v36 = vsel %vm156_vm4, %v153_v34, 0.0 }
 0x15f   :  { %v157_v35 = vsel %vm156_vm4, %v148_v33, 0.0 }
 0x160   :  { %158 = vadd.xlane.f32.xlu1 %v157_v35 }
 0x164   :  { %161 = vadd.xlane.f32.xlu1 %v160_v36 }
 0x1ed   :  { %v159_v37 = vpop.xlane.xlu1 %158 }
 0x1ee   :  { %v164_v38 = vmul.f32 0.03125, %v159_v37 }
 0x1f0   :  { %v166_v39 = vsub.f32 %v148_v33, %v164_v38  ;;  %v202_v38 = vrot.slane %v198_v18, %v4111_v60 }
 0x1f1   :  { %v162_v40 = vpop.xlane.xlu1 %161 }
 0x1f2   :  { %v165_v41 = vmul.f32 0.03125, %v162_v40  ;;  %v168_v42 = vmul.f32 %v166_v39, %v166_v39 }
 0x1f4   :  { %v167_v43 = vsub.f32 %v153_v34, %v165_v41  ;;  %v170_v44 = vsel %vm156_vm4, %v168_v42, 0.0  ;;  %v4196_v41 = vsel %vm203_vm5, %v202_v38, -3.4028235e+38 }
 0x1f5   :  { %171 = vadd.xlane.f32.xlu0 %v170_v44 }
 0x1f6   :  { %v169_v45 = vmul.f32 %v167_v43, %v167_v43 }
 0x1f8   :  { %v173_v46 = vsel %vm156_vm4, %v169_v45, 0.0 }
 0x1f9   :  { %174 = vadd.xlane.f32.xlu1 %v173_v46 }
 0x282   :  { %v172_v53 = vpop.xlane.xlu0 %171 }
 0x283   :  { %v176_v54 = vmul.f32 0.03125, %v172_v53 }
 0x285   :  { %v178_v55 = vadd.f32 1e-12, %v176_v54 }
 0x286   :  { %v175_v56 = vpop.xlane.xlu1 %174 }
 0x287   :  { %3840 = vrsqrt.f32 %v178_v55  ;;  %v177_v57 = vmul.f32 0.03125, %v175_v56 }
 0x289   :  { %v179_v59 = vadd.f32 1e-12, %v177_v57 }
 0x28b   :  { %3842 = vrsqrt.f32 %v179_v59 }
 0x291   :  { %v3841_v0 = vpop.eup %3840 }
 0x292   :  { %v182_v1 = vmul.f32 %v3841_v0, %v166_v39 }
 0x294   :  { %v188_v3 = vmul.f32 %v187_v63, %v182_v1 }
 0x295   :  { %v3843_v4 = vpop.eup %3842 }
 0x296   :  { %v183_v5 = vmul.f32 %v3843_v4, %v167_v43  ;;  %v4125_v6 = vadd.f32 %v193_v2, %v188_v3 }
 0x298   :  { %v189_v7 = vmul.f32 %v187_v63, %v183_v5  ;;  %3266 = vmatprep.mubr.msk.f32.mxu0 %vm156_vm4, %v4125_v6 }
 0x29a   :  { %v4129_v8 = vadd.f32 %v193_v2, %v189_v7 }
 0x29c   :  { %3267 = vmatmul.mubr.msk.f32.vlgmr.msra.gmra.mrb[2].mxu0 %vm156_vm4, %v4129_v8 }
 0x36f   :  { %v3268_v11 = vpop.f32.mrb[2].mxu0 }
 0x370   :  { %v4138_v12 = vadd.f32 %v3268_v11, %v221_v10  ;;  %v294_v13 = vpop.f32.mrb[3].mxu0 }
 0x371   :  { %v4140_v14 = vadd.f32 %v294_v13, %v221_v10 }
 0x372   :  { %504 = vrot.lane.b32.xlu0 %v4138_v12, %s3966_s13 }
 0x373   :  { %3273 = vmatprep.mubr.msk.f32.mxu1 %vm203_vm5, %v4140_v14  ;;  %v4148_v15 = vpack.i.bf16 %v4138_v12, %v4140_v14 }
 0x375   :  { %3761 = vrot.lane.b32.xlu1 %v4148_v15, %s3967_s14 }
 0x379   :  { %3766 = vrot.lane.b32.xlu1 %v4148_v15, %s3968_s15 }
 0x37d   :  { %502 = vrot.lane.b32.xlu1 %v4140_v14, %s3966_s13 }
 0x381   :  { %3771 = vrot.lane.b32.xlu1 %v4148_v15, %s3969_s16 }
 0x385   :  { %702 = vrot.lane.b32.xlu1 %v4140_v14, %s3970_s19 }
 0x389   :  { %704 = vrot.lane.b32.xlu1 %v4138_v12, %s3970_s19 }
 0x38d   :  { %210 = vrot.lane.b32.xlu1 %v208_v19, %s3972_s20 }
 0x3e4   :  { %v505_v35 = vpop.permute.xlu0 %504 }
 0x3e7   :  { %v3762_v20 = vpop.permute.xlu1 %3761 }
 0x3e8   :  { %v3764_v21 = vunpack.i.h.bf16 %v3762_v20  ;;  %v3763_v22 = vunpack.i.l.bf16 %v3762_v20 }
 0x3ea   :  { %v3549_v24 = vpack.c.bf16 %v3764_v21, %v3763_v22 }
 0x3eb   :  { %v3767_v26 = vpop.permute.xlu1 %3766 }
 0x3ec   :  { %v3769_v27 = vunpack.i.h.bf16 %v3767_v26  ;;  %v3768_v28 = vunpack.i.l.bf16 %v3767_v26  ;;  %3551 = vmatprep.subr.msk.bf16.mxu1 %vm4169_vm7, %v3549_v24 }
 0x3ed   :  { %3554 = vmatpush3.bf16.xpose.msk.msra.mxu1 %vm4169_vm7, %v3549_v24 }
 0x3ee   :  { %v3559_v29 = vpack.c.bf16 %v3769_v27, %v3768_v28 }
 0x3ef   :  { %v503_v30 = vpop.permute.xlu1 %502 }
 0x3f0   :  { %3561 = vmatprep.subr.msk.bf16.mxu1 %vm4169_vm7, %v3559_v29 }
 0x3f3   :  { %v3772_v31 = vpop.permute.xlu1 %3771 }
 0x3f4   :  { %v3774_v32 = vunpack.i.h.bf16 %v3772_v31  ;;  %v3773_v33 = vunpack.i.l.bf16 %v3772_v31  ;;  %3274 = vmatmul.mubr.msk.f32.vlgmr.msra.gmra.mrb[0].mxu1 %vm203_vm5, %v4138_v12 }
 0x3f5   :  { %3564 = vmatpush3.bf16.xpose.msk.msra.mxu1 %vm4169_vm7, %v3559_v29  ;;  %3287 = vmatprep.mubr.msk.f32.mxu1 %vm203_vm5, %v503_v30 }
 0x3f6   :  { %v3569_v34 = vpack.c.bf16 %v3774_v32, %v3773_v33 }
 0x3f7   :  { %v703_v36 = vpop.permute.xlu1 %702 }
 0x3f8   :  { %3571 = vmatprep.subr.msk.bf16.mxu1 %vm4169_vm7, %v3569_v34 }
 0x3fb   :  { %v705_v37 = vpop.permute.xlu1 %704 }
 0x3fc   :  { %3288 = vmatmul.mubr.msk.f32.vlgmr.msra.gmra.mrb[2].mxu1 %vm203_vm5, %v505_v35 }
 0x3fd   :  { %3574 = vmatpush3.bf16.xpose.msk.msra.mxu1 %vm4169_vm7, %v3569_v34  ;;  %3301 = vmatprep.mubr.msk.f32.mxu1 %vm203_vm5, %v703_v36 }
 0x3ff   :  { %v211_v39 = vpop.permute.xlu1 %210 }
 0x400   :  { %v4193_v40 = vsel %vm203_vm5, -3.4028235e+38, %v211_v39 }
 0x404   :  { %3302 = vmatmul.mubr.msk.f32.vlgmr.msra.gmra.mrb[4].mxu1 %vm203_vm5, %v705_v37 }
 0x4c7   :  { %v3275_v42 = vpop.f32.mrb[0].mxu1 }
 0x4c8   :  { %v389_v43 = vadd.f32 %v3275_v42, %v4193_v40  ;;  %v383_v44 = vpop.f32.mrb[1].mxu1 }
 0x4c9   :  { %v384_v45 = vadd.f32 %v383_v44, %v4196_v41 }
 0x4ca   :  { %v396_v46 = vsel %vm392_vm8, %v389_v43, -inf }
 0x4cb   :  { %397 = vmax.xlane.f32.xlu0 %v396_v46  ;;  %v393_v47 = vsel %vm392_vm8, %v384_v45, -inf }
 0x4cc   :  { %394 = vmax.xlane.f32.xlu1 %v393_v47 }
 0x4cf   :  { %v3289_v48 = vpop.f32.mrb[2].mxu1 }
 0x4d0   :  { %v590_v49 = vadd.f32 %v3289_v48, %v4193_v40  ;;  %v584_v50 = vpop.f32.mrb[3].mxu1 }
 0x4d1   :  { %v585_v51 = vadd.f32 %v584_v50, %v4196_v41 }
 0x4d2   :  { %v596_v52 = vsel %vm392_vm8, %v590_v49, -inf }
 0x4d3   :  { %597 = vmax.xlane.f32.xlu0 %v596_v52  ;;  %v593_v53 = vsel %vm392_vm8, %v585_v51, -inf }
 0x4d4   :  { %594 = vmax.xlane.f32.xlu1 %v593_v53 }
 0x4d7   :  { %v3303_v54 = vpop.f32.mrb[4].mxu1 }
 0x4d8   :  { %v790_v55 = vadd.f32 %v3303_v54, %v4193_v40  ;;  %v784_v56 = vpop.f32.mrb[5].mxu1 }
 0x4d9   :  { %v785_v57 = vadd.f32 %v784_v56, %v4196_v41 }
 0x4da   :  { %v796_v59 = vsel %vm392_vm8, %v790_v55, -inf }
 0x4db   :  { %797 = vmax.xlane.f32.xlu0 %v796_v59  ;;  %v793_v63 = vsel %vm392_vm8, %v785_v57, -inf }
 0x4dc   :  { %794 = vmax.xlane.f32.xlu1 %v793_v63 }
 0x4ed   :  { %3776 = vrot.lane.b32.xlu1 %v4148_v15, %s3973_s1 }
 0x558   :  { %v398_v0 = vpop.xlane.xlu0 %397 }
 0x559   :  { %v400_v1 = vsub.f32 %v389_v43, %v398_v0  ;;  %v395_v2 = vpop.xlane.xlu1 %394 }
 0x55a   :  { %v399_v3 = vsub.f32 %v384_v45, %v395_v2 }
 0x55b   :  { %v403_v4 = vmul.f32 1.442695, %v400_v1 }
 0x55c   :  { %v401_v5 = vmul.f32 1.442695, %v399_v3 }
 0x55d   :  { %3844 = vpow2.f32 %v403_v4 }
 0x55e   :  { %3846 = vpow2.f32 %v401_v5 }
 0x560   :  { %v598_v7 = vpop.xlane.xlu0 %597 }
 0x561   :  { %v600_v10 = vsub.f32 %v590_v49, %v598_v7  ;;  %v595_v11 = vpop.xlane.xlu1 %594 }
 0x562   :  { %v599_v13 = vsub.f32 %v585_v51, %v595_v11 }
 0x563   :  { %v603_v16 = vmul.f32 1.442695, %v600_v10 }
 0x564   :  { %v601_v17 = vmul.f32 1.442695, %v599_v13 }
 0x565   :  { %3848 = vpow2.f32 %v603_v16 }
 0x566   :  { %3850 = vpow2.f32 %v601_v17 }
 0x567   :  { %v3845_v18 = vpop.eup %3844 }
 0x568   :  { %v3847_v19 = vpop.eup %3846  ;;  %v798_v20 = vpop.xlane.xlu0 %797  ;;  %v408_v21 = vsel %vm392_vm8, %v3845_v18, 0.0 }
 0x569   :  { %v800_v22 = vsub.f32 %v790_v55, %v798_v20  ;;  %409 = vadd.xlane.f32.xlu0 %v408_v21  ;;  %v795_v24 = vpop.xlane.xlu1 %794  ;;  %v405_v26 = vsel %vm392_vm8, %v3847_v19, 0.0 }
 0x56a   :  { %406 = vadd.xlane.f32.xlu1 %v405_v26  ;;  %v799_v38 = vsub.f32 %v785_v57, %v795_v24 }
 0x56b   :  { %v803_v27 = vmul.f32 1.442695, %v800_v22 }
 0x56c   :  { %v801_v39 = vmul.f32 1.442695, %v799_v38 }
 0x56d   :  { %3852 = vpow2.f32 %v803_v27  ;;  %v3777_v28 = vpop.permute.xlu1 %3776 }
 0x56e   :  { %v3779_v29 = vunpack.i.h.bf16 %v3777_v28  ;;  %v3778_v30 = vunpack.i.l.bf16 %v3777_v28  ;;  %3854 = vpow2.f32 %v801_v39 }
 0x56f   :  { %v3849_v31 = vpop.eup %3848 }
 0x570   :  { %v3851_v32 = vpop.eup %3850  ;;  %v3555_v33 = vpack.c.bf16 %v3779_v29, %v3778_v30  ;;  %v608_v34 = vsel %vm392_vm8, %v3849_v31, 0.0 }
 0x571   :  { %609 = vadd.xlane.f32.xlu0 %v608_v34  ;;  %v605_v35 = vsel %vm392_vm8, %v3851_v32, 0.0 }
 0x572   :  { %606 = vadd.xlane.f32.xlu1 %v605_v35  ;;  %3556 = vmatprep.subr.bf16.mxu0 %v3555_v33 }
 0x573   :  { %3558 = vmatpush3.bf16.msra.mxu0 %v3555_v33 }
 0x577   :  { %v3853_v36 = vpop.eup %3852 }
 0x578   :  { %v808_v37 = vsel %vm392_vm8, %v3853_v36, 0.0  ;;  %v3855_v42 = vpop.eup %3854 }
 0x579   :  { %809 = vadd.xlane.f32.xlu0 %v808_v37  ;;  %v805_v43 = vsel %vm392_vm8, %v3855_v42, 0.0 }
 0x583   :  { %3786 = vrot.lane.b32.xlu1 %v4148_v15, %s3974_s21 }
 0x587   :  { %3791 = vrot.lane.b32.xlu1 %v4148_v15, %s3975_s22 }
 0x58f   :  { %3781 = vrot.lane.b32.xlu0 %v4148_v15, %s3976_s2 }
 0x593   :  { %902 = vrot.lane.b32.xlu0 %v4140_v14, %s3977_s23 }
 0x5ab   :  { %806 = vadd.xlane.f32.xlu1 %v805_v43 }
 0x5bc   :  { %904 = vrot.lane.b32.xlu1 %v4138_v12, %s3977_s23 }
 0x5f6   :  { %v410_v44 = vpop.xlane.xlu0 %409 }
 0x5f7   :  { %3856 = vrcp.f32 %v410_v44  ;;  %v407_v45 = vpop.xlane.xlu1 %406 }
 0x5f8   :  { %3858 = vrcp.f32 %v407_v45 }
 0x5fe   :  { %v610_v48 = vpop.xlane.xlu0 %609 }
 0x5ff   :  { %v607_v46 = vpop.xlane.xlu1 %606 }
 0x600   :  { %3860 = vrcp.f32 %v607_v46 }
 0x601   :  { %v3857_v47 = vpop.eup %3856  ;;  %3862 = vrcp.f32 %v610_v48 }
 0x602   :  { %v3859_v49 = vpop.eup %3858  ;;  %v414_v50 = vmul.f32 %v3857_v47, %v3845_v18 }
 0x603   :  { %v413_v14 = vmul.f32 %v3859_v49, %v3847_v19  ;;  %v3787_v51 = vpop.permute.xlu1 %3786 }
 0x604   :  { %v3789_v12 = vunpack.i.h.bf16 %v3787_v51  ;;  %v3788_v55 = vunpack.i.l.bf16 %v3787_v51 }
 0x605   :  { %3280 = vmatprep.mubr.msk.f32.mxu0 %vm392_vm8, %v413_v14 }
 0x606   :  { %v810_v52 = vpop.xlane.xlu0 %809  ;;  %3281 = vmatmul.mubr.msk.f32.vlgmr.msra.gmra.mrb[4].mxu0 %vm392_vm8, %v414_v50  ;;  %v3575_v2 = vpack.c.bf16 %v3789_v12, %v3788_v55  ;;  %v1133_v12 = vld [vmem:[%s4674_s6] sm:$0xff]  ;;  %v1135_v55 = vld [vmem:[%s4674_s6 + $0x10] sm:$0xff] }
 0x607   :  { %v3792_v63 = vpop.permute.xlu1 %3791  ;;  %3864 = vrcp.f32 %v810_v52 }
 0x608   :  { %v3794_v3 = vunpack.i.h.bf16 %v3792_v63  ;;  %v3793_v4 = vunpack.i.l.bf16 %v3792_v63 }
 0x60a   :  { %v3861_v53 = vpop.eup %3860  ;;  %v3782_v54 = vpop.permute.xlu0 %3781  ;;  %v3579_v7 = vpack.c.bf16 %v3794_v3, %v3793_v4 }
 0x60b   :  { %v3784_v56 = vunpack.i.h.bf16 %v3782_v54  ;;  %v3783_v57 = vunpack.i.l.bf16 %v3782_v54  ;;  %v613_v59 = vmul.f32 %v3861_v53, %v3851_v32  ;;  %v3863_v1 = vpop.eup %3862  ;;  %v1134_v54 = vld [vmem:[%s4674_s6 + $0x8] sm:$0xff] }
 0x60c   :  { %v614_v5 = vmul.f32 %v3863_v1, %v3849_v31 }
 0x60d   :  { %v3565_v0 = vpack.c.bf16 %v3784_v56, %v3783_v57  ;;  %3294 = vmatprep.mubr.msk.f32.mxu0 %vm392_vm8, %v613_v59  ;;  %v3589_v56 = vpack.c.bf16 %v1134_v54, %v1133_v12  ;;  %v1136_v57 = vld [vmem:[%s4674_s6 + $0x18] sm:$0xff] }
 0x60e   :  { %v903_v18 = vpop.permute.xlu0 %902  ;;  %v3593_v59 = vpack.c.bf16 %v1136_v57, %v1135_v55 }
 0x60f   :  { %3566 = vmatprep.subr.bf16.mxu0 %v3565_v0 }
 0x610   :  { %3568 = vmatpush3.bf16.msra.mxu0 %v3565_v0 }
 0x611   :  { %3576 = vmatprep.subr.bf16.mxu0 %v3575_v2  ;;  %v3865_v11 = vpop.eup %3864 }
 0x612   :  { %v814_v17 = vmul.f32 %v3865_v11, %v3853_v36 }
 0x613   :  { %3295 = vmatmul.mubr.msk.f32.vlgmr.msra.gmra.mrb[6].mxu0 %vm392_vm8, %v614_v5 }
 0x614   :  { %3578 = vmatpush3.bf16.msra.mxu0 %v3575_v2 }
 0x615   :  { %3581 = vmatprep.subr.msk.bf16.mxu0 %vm4169_vm7, %v3579_v7 }
 0x638   :  { %v807_v10 = vpop.xlane.xlu1 %806 }
 0x639   :  { %3866 = vrcp.f32 %v807_v10 }
 0x63c   :  { %v905_v19 = vpop.permute.xlu1 %904 }
 0x643   :  { %v3867_v13 = vpop.eup %3866 }
 0x644   :  { %v813_v16 = vmul.f32 %v3867_v13, %v3855_v42 }
 0x646   :  { %3308 = vmatprep.mubr.msk.f32.mxu0 %vm392_vm8, %v813_v16 }
 0x647   :  { %3309 = vmatmul.mubr.msk.f32.vlgmr.msra.gmra.mrb[8].mxu0 %vm392_vm8, %v814_v17 }
 0x648   :  { %3584 = vmatpush3.bf16.xpose.msk.msra.mxu0 %vm4169_vm7, %v3579_v7  ;;  %3315 = vmatprep.mubr.msk.f32.mxu0 %vm203_vm5, %v903_v18 }
 0x64f   :  { %3316 = vmatmul.mubr.msk.f32.vlgmr.msra.gmra.mrb[10].mxu0 %vm203_vm5, %v905_v19  ;;  %v1139_v19 = vsub.s32 3, %v4108_v58 }
 0x6d9   :  { %v4240_v20 = vpop.f32.mrb[4].mxu0 }
 0x6da   :  { %v4242_v21 = vpop.f32.mrb[5].mxu0 }
 0x6e6   :  { %v3296_v22 = vpop.f32.mrb[6].mxu0 }
 0x6e7   :  { %v693_v24 = vpop.f32.mrb[7].mxu0 }
 0x71a   :  { %v3310_v26 = vpop.f32.mrb[8].mxu0 }
 0x71b   :  { %v893_v27 = vpop.f32.mrb[9].mxu0 }
 0x722   :  { %v3317_v28 = vpop.f32.mrb[10].mxu0 }
 0x723   :  { %v990_v29 = vadd.f32 %v3317_v28, %v4193_v40  ;;  %v984_v30 = vpop.f32.mrb[11].mxu0 }
 0x724   :  { %v985_v31 = vadd.f32 %v984_v30, %v4196_v41 }
 0x725   :  { %v996_v32 = vsel %vm392_vm8, %v990_v29, -inf }
 0x726   :  { %997 = vmax.xlane.f32.xlu1 %v996_v32  ;;  %v993_v33 = vsel %vm392_vm8, %v985_v31, -inf }
 0x727   :  { %994 = vmax.xlane.f32.xlu0 %v993_v33 }
 0x737   :  { %3796 = vrot.lane.b32.xlu1 %v4148_v15, %s3978_s24 }
 0x73b   :  { %1106 = vrot.lane.b32.xlu1 %v3296_v22, %s3972_s20 }
 0x73f   :  { %1112 = vrot.lane.b32.xlu1 %v893_v27, %s3979_s3 }
 0x7b3   :  { %v998_v34 = vpop.xlane.xlu1 %997 }
 0x7b4   :  { %v1000_v35 = vsub.f32 %v990_v29, %v998_v34  ;;  %v995_v36 = vpop.xlane.xlu0 %994 }
 0x7b5   :  { %v999_v37 = vsub.f32 %v985_v31, %v995_v36 }
 0x7b6   :  { %v1003_v38 = vmul.f32 1.442695, %v1000_v35 }
 0x7b7   :  { %v1001_v39 = vmul.f32 1.442695, %v999_v37  ;;  %v3797_v42 = vpop.permute.xlu1 %3796 }
 0x7b8   :  { %v3799_v43 = vunpack.i.h.bf16 %v3797_v42  ;;  %v3798_v44 = vunpack.i.l.bf16 %v3797_v42  ;;  %v1263_v42 = vld [vmem:[%s4675_s7 + $0x8] sm:$0xff] }
 0x7b9   :  { %3868 = vpow2.f32 %v1001_v39 }
 0x7ba   :  { %v3585_v45 = vpack.c.bf16 %v3799_v43, %v3798_v44  ;;  %3870 = vpow2.f32 %v1003_v38  ;;  %v1264_v44 = vld [vmem:[%s4675_s7 + $0x10] sm:$0xff] }
 0x7bb   :  { %v1107_v2 = vpop.permute.xlu1 %1106 }
 0x7bc   :  { %3586 = vmatprep.subr.bf16.mxu1 %v3585_v45  ;;  %v1127_v10 = vsel %vm203_vm5, %v4240_v20, %v1107_v2  ;;  %v1403_v2 = vld [vmem:[%s4676_s8] sm:$0xff] }
 0x7bd   :  { %3588 = vmatpush3.bf16.msra.mxu1 %v3585_v45  ;;  %v1265_v45 = vld [vmem:[%s4675_s7 + $0x18] sm:$0xff] }
 0x7be   :  { %3590 = vmatprep.subr.bf16.mxu1 %v3589_v56 }
 0x7bf   :  { %v1113_v4 = vpop.permute.xlu1 %1112 }
 0x7c3   :  { %v3869_v15 = vpop.eup %3868 }
 0x7c4   :  { %v1005_v46 = vsel %vm392_vm8, %v3869_v15, 0.0  ;;  %v3871_v47 = vpop.eup %3870 }
 0x7c5   :  { %1006 = vadd.xlane.f32.xlu0 %v1005_v46  ;;  %v1008_v48 = vsel %vm392_vm8, %v3871_v47, 0.0 }
 0x7c9   :  { %1009 = vadd.xlane.f32.xlu0 %v1008_v48 }
 0x7df   :  { %1104 = vrot.lane.b32.xlu0 %v693_v24, %s3972_s20 }
 0x7e3   :  { %1114 = vrot.lane.b32.xlu0 %v3310_v26, %s3979_s3 }
 0x852   :  { %v1007_v49 = vpop.xlane.xlu0 %1006 }
 0x853   :  { %3872 = vrcp.f32 %v1007_v49 }
 0x856   :  { %v1010_v14 = vpop.xlane.xlu0 %1009 }
 0x857   :  { %3874 = vrcp.f32 %v1010_v14 }
 0x85a   :  { %v1105_v1 = vpop.permute.xlu0 %1104 }
 0x85b   :  { %v1126_v5 = vsel %vm203_vm5, %v4242_v21, %v1105_v1  ;;  %v1140_v21 = vrot.slane %v4116_v61, %v1139_v19 }
 0x85c   :  { %v1128_v13 = vsel %vm392_vm8, %v1126_v5, %v1113_v4  ;;  %v1405_v5 = vld [vmem:[%s4676_s8 + $0x10] sm:$0xff] }
 0x85d   :  { %v3873_v50 = vpop.eup %3872 }
 0x85e   :  { %v1013_v51 = vmul.f32 %v3873_v50, %v3869_v15  ;;  %v1115_v3 = vpop.permute.xlu0 %1114  ;;  %v3601_v15 = vpack.c.bf16 %v1265_v45, %v1264_v44 }
 0x85f   :  { %v1129_v16 = vsel %vm392_vm8, %v1127_v10, %v1115_v3  ;;  %v1404_v3 = vld [vmem:[%s4676_s8 + $0x8] sm:$0xff] }
 0x860   :  { %3322 = vmatprep.mubr.msk.f32.mxu1 %vm392_vm8, %v1013_v51  ;;  %v1252_v51 = vsub.s32 4, %v4108_v58  ;;  %v3605_v4 = vpack.c.bf16 %v1404_v3, %v1403_v2 }
 0x861   :  { %v3875_v52 = vpop.eup %3874 }
 0x862   :  { %v1014_v53 = vmul.f32 %v3875_v52, %v3871_v47  ;;  %v1258_v52 = vsub.s32 5, %v4108_v58 }
 0x864   :  { %3323 = vmatmul.mubr.msk.f32.vlgmr.msra.gmra.mrb[6].mxu1 %vm392_vm8, %v1014_v53  ;;  %v1253_v53 = vrot.slane %v4116_v61, %v1252_v51  ;;  %v1259_v57 = vrot.slane %v4116_v61, %v1258_v52 }
 0x865   :  { %3592 = vmatpush3.bf16.msra.mxu1 %v3589_v56 }
 0x866   :  { %3594 = vmatprep.subr.bf16.mxu1 %v3593_v59 }
 0x869   :  { %3596 = vmatpush3.bf16.msra.mxu1 %v3593_v59 }
 0x86a   :  { %3606 = vmatprep.subr.bf16.mxu1 %v3605_v4 }
 0x937   :  { %v3324_v63 = vpop.f32.mrb[6].mxu1 }
 0x938   :  { %1122 = vrot.lane.b32.xlu0 %v3324_v63, %s3980_s12  ;;  %v1093_v0 = vpop.f32.mrb[7].mxu1 }
 0x939   :  { %1120 = vrot.lane.b32.xlu1 %v1093_v0, %s3980_s12 }
 0x9aa   :  { %v1123_v7 = vpop.permute.xlu0 %1122 }
 0x9ab   :  { %v1121_v11 = vpop.permute.xlu1 %1120  ;;  %v1132_v18 = vsel %vm1130_vm9, %v1129_v16, %v1123_v7  ;;  %v1406_v7 = vld [vmem:[%s4676_s8 + $0x18] sm:$0xff] }
 0x9ac   :  { %v1131_v17 = vsel %vm1130_vm9, %v1128_v13, %v1121_v11  ;;  %v3609_v10 = vpack.c.bf16 %v1406_v7, %v1405_v5  ;;  %v1407_v11 = vld [vmem:[%s4676_s8 + $0x20] sm:$0xff]  ;;  %v1408_v13 = vld [vmem:[%s4676_s8 + $0x28] sm:$0xff] }
 0x9ad   :  { %3333 = vmatprep.mubr.msk.f32.mxu1 %vm156_vm4, %v1131_v17  ;;  %v3613_v16 = vpack.c.bf16 %v1408_v13, %v1407_v11  ;;  %v1409_v17 = vld [vmem:[%s4676_s8 + $0x30] sm:$0xff] }
 0x9ae   :  { %3334 = vmatmul.mubr.msk.f32.vlgmr.msra.gmra.mrb[8].mxu1 %vm156_vm4, %v1132_v18  ;;  %v1410_v18 = vld [vmem:[%s4676_s8 + $0x38] sm:$0xff] }
 0x9af   :  { %3608 = vmatpush3.bf16.msra.mxu1 %v3605_v4 }
 0x9b0   :  { %3610 = vmatprep.subr.bf16.mxu1 %v3609_v10 }
 0x9b3   :  { %3612 = vmatpush3.bf16.msra.mxu1 %v3609_v10 }
 0x9b4   :  { %3614 = vmatprep.subr.bf16.mxu1 %v3613_v16 }
 0x9b7   :  { %3616 = vmatpush3.bf16.msra.mxu1 %v3613_v16 }
 0xa81   :  { %v3335_v20 = vpop.f32.mrb[8].mxu1 }
 0xa82   :  { %v1219_v22 = vadd.f32 %v3335_v20, %v1140_v21  ;;  %v1213_v24 = vpop.f32.mrb[9].mxu1  ;;  %v1411_v20 = vld [vmem:[%s4676_s8 + $0x40] sm:$0xff] }
 0xa83   :  { %v1214_v26 = vadd.f32 %v1213_v24, %v1140_v21  ;;  %v3617_v21 = vpack.c.bf16 %v1410_v18, %v1409_v17 }
 0xa84   :  { %v1223_v27 = vadd.f32 %v1219_v22, %v4129_v8  ;;  %v1412_v22 = vld [vmem:[%s4676_s8 + $0x48] sm:$0xff] }
 0xa85   :  { %v1222_v28 = vadd.f32 %v1214_v26, %v4125_v6  ;;  %v1262_v6 = vld [vmem:[%s4675_s7] sm:$0xff]  ;;  %3618 = vmatprep.subr.bf16.mxu1 %v3617_v21  ;;  %v3621_v24 = vpack.c.bf16 %v1412_v22, %v1411_v20  ;;  %v1413_v26 = vld [vmem:[%s4676_s8 + $0x50] sm:$0xff] }
 0xa86   :  { %v1227_v29 = vsel %vm156_vm4, %v1223_v27, 0.0  ;;  %v3597_v43 = vpack.c.bf16 %v1263_v42, %v1262_v6  ;;  %3620 = vmatpush3.bf16.msra.mxu1 %v3617_v21 }
 0xa87   :  { %1228 = vadd.xlane.f32.xlu0 %v1227_v29  ;;  %v1224_v30 = vsel %vm156_vm4, %v1222_v28, 0.0  ;;  %3622 = vmatprep.subr.bf16.mxu1 %v3621_v24  ;;  %v1415_v29 = vld [vmem:[%s4676_s8 + $0x60] sm:$0xff] }
 0xa88   :  { %1225 = vadd.xlane.f32.xlu1 %v1224_v30  ;;  %3598 = vmatprep.subr.bf16.mxu0 %v3597_v43  ;;  %v1416_v30 = vld [vmem:[%s4676_s8 + $0x68] sm:$0xff] }
 0xa89   :  { %3600 = vmatpush3.bf16.msra.mxu0 %v3597_v43 }
 0xa8a   :  { %3602 = vmatprep.subr.bf16.mxu0 %v3601_v15  ;;  %3624 = vmatpush3.bf16.msra.mxu1 %v3621_v24 }
 0xa8d   :  { %3604 = vmatpush3.bf16.msra.mxu0 %v3601_v15 }
 0xb14   :  { %v1229_v31 = vpop.xlane.xlu0 %1228 }
 0xb15   :  { %v1231_v32 = vmul.f32 0.03125, %v1229_v31  ;;  %v1226_v33 = vpop.xlane.xlu1 %1225  ;;  %v3629_v31 = vpack.c.bf16 %v1416_v30, %v1415_v29 }
 0xb16   :  { %v1230_v34 = vmul.f32 0.03125, %v1226_v33  ;;  %v1418_v33 = vld [vmem:[%s4676_s8 + $0x78] sm:$0xff] }
 0xb17   :  { %v1233_v35 = vsub.f32 %v1223_v27, %v1231_v32  ;;  %v1414_v27 = vld [vmem:[%s4676_s8 + $0x58] sm:$0xff]  ;;  %v1417_v32 = vld [vmem:[%s4676_s8 + $0x70] sm:$0xff] }
 0xb18   :  { %v1232_v36 = vsub.f32 %v1222_v28, %v1230_v34  ;;  %v3625_v28 = vpack.c.bf16 %v1414_v27, %v1413_v26  ;;  %v3633_v34 = vpack.c.bf16 %v1418_v33, %v1417_v32 }
 0xb19   :  { %v1235_v37 = vmul.f32 %v1233_v35, %v1233_v35 }
 0xb1a   :  { %v1234_v38 = vmul.f32 %v1232_v36, %v1232_v36  ;;  %3626 = vmatprep.subr.bf16.mxu1 %v3625_v28 }
 0xb1b   :  { %v1239_v39 = vsel %vm156_vm4, %v1235_v37, 0.0  ;;  %3628 = vmatpush3.bf16.msra.mxu1 %v3625_v28 }
 0xb1c   :  { %1240 = vadd.xlane.f32.xlu1 %v1239_v39  ;;  %v1236_v8 = vsel %vm156_vm4, %v1234_v38, 0.0  ;;  %3630 = vmatprep.subr.bf16.mxu1 %v3629_v31 }
 0xb1d   :  { %1237 = vadd.xlane.f32.xlu0 %v1236_v8 }
 0xb1f   :  { %3632 = vmatpush3.bf16.msra.mxu1 %v3629_v31 }
 0xb20   :  { %3634 = vmatprep.subr.bf16.mxu1 %v3633_v34 }
 0xb23   :  { %3636 = vmatpush3.bf16.msra.mxu1 %v3633_v34 }
 0xba9   :  { %v1241_v46 = vpop.xlane.xlu1 %1240 }
 0xbaa   :  { %v1243_v47 = vmul.f32 0.03125, %v1241_v46  ;;  %v1238_v48 = vpop.xlane.xlu0 %1237 }
 0xbab   :  { %v1242_v49 = vmul.f32 0.03125, %v1238_v48 }
 0xbac   :  { %v1245_v14 = vadd.f32 1e-12, %v1243_v47 }
 0xbad   :  { %v1244_v50 = vadd.f32 1e-12, %v1242_v49 }
 0xbae   :  { %3876 = vrsqrt.f32 %v1245_v14 }
 0xbaf   :  { %3878 = vrsqrt.f32 %v1244_v50 }
 0xbb8   :  { %v3877_v12 = vpop.eup %3876 }
 0xbb9   :  { %v3879_v54 = vpop.eup %3878  ;;  %v1249_v55 = vmul.f32 %v3877_v12, %v1233_v35  ;;  %v1268_v35 = vsub.s32 6, %v4108_v58 }
 0xbba   :  { %v1248_v56 = vmul.f32 %v3879_v54, %v1232_v36 }
 0xbbb   :  { %v1255_v59 = vmul.f32 %v1253_v53, %v1249_v55  ;;  %v1269_v36 = vrot.slane %v4116_v61, %v1268_v35 }
 0xbbc   :  { %v1254_v63 = vmul.f32 %v1253_v53, %v1248_v56 }
 0xbbd   :  { %v4314_v1 = vadd.f32 %v1259_v57, %v1255_v59 }
 0xbbe   :  { %v4312_v0 = vadd.f32 %v1259_v57, %v1254_v63 }
 0xbc0   :  { %3344 = vmatprep.mubr.msk.f32.mxu0 %vm156_vm4, %v4312_v0 }
 0xbc1   :  { %3345 = vmatmul.mubr.msk.f32.vlgmr.msra.gmra.mrb[12].mxu0 %vm156_vm4, %v4314_v1 }
 0xc94   :  { %v3346_v37 = vpop.f32.mrb[12].mxu0 }
 0xc95   :  { %v1348_v38 = vadd.f32 %v3346_v37, %v1269_v36  ;;  %v1342_v39 = vpop.f32.mrb[13].mxu0 }
 0xc96   :  { %v1343_v8 = vadd.f32 %v1342_v39, %v1269_v36 }
 0xc97   :  { %v1354_v6 = vmul.f32 0.70710677, %v1348_v38 }
 0xc98   :  { %v1353_v42 = vmul.f32 0.70710677, %v1343_v8  ;;  %v1351_v37 = vmul.f32 0.5, %v1343_v8 }
 0xc99   :  { %v1356_v43 = vand.u32 2147483647, %v1354_v6  ;;  %vm1394_vm10 = vcmp.lt.f32.partialorder %v1354_v6, 0.0 }
 0xc9a   :  { %v1355_v44 = vand.u32 2147483647, %v1353_v42  ;;  %vm1393_vm11 = vcmp.lt.f32.partialorder %v1353_v42, 0.0 }
 0xc9b   :  { %v1358_v45 = vmul.f32 0.3275911, %v1356_v43  ;;  %v1382_v48 = vsub.f32 0.0, %v1356_v43 }
 0xc9c   :  { %v1357_v15 = vmul.f32 0.3275911, %v1355_v44  ;;  %v1381_v49 = vsub.f32 0.0, %v1355_v44 }
 0xc9d   :  { %v1360_v46 = vadd.f32 1.0, %v1358_v45  ;;  %v1384_v50 = vmul.f32 %v1382_v48, %v1356_v43  ;;  %v1352_v43 = vmul.f32 0.5, %v1348_v38 }
 0xc9e   :  { %v1359_v47 = vadd.f32 1.0, %v1357_v15  ;;  %v1383_v54 = vmul.f32 %v1381_v49, %v1355_v44  ;;  %v1421_v15 = vsub.s32 7, %v4108_v58 }
 0xc9f   :  { %3880 = vrcp.f32 %v1360_v46  ;;  %v1387_v57 = vmul.f32 1.442695, %v1384_v50 }
 0xca0   :  { %3882 = vrcp.f32 %v1359_v47  ;;  %v1385_v2 = vmul.f32 1.442695, %v1383_v54  ;;  %v1422_v46 = vrot.slane %v4116_v61, %v1421_v15 }
 0xca1   :  { %3884 = vpow2.f32 %v1387_v57 }
 0xca2   :  { %3886 = vpow2.f32 %v1385_v2 }
 0xca9   :  { %v3881_v14 = vpop.eup %3880 }
 0xcaa   :  { %v3883_v53 = vpop.eup %3882  ;;  %v1364_v12 = vmul.f32 1.0614054, %v3881_v14 }
 0xcab   :  { %v1363_v55 = vmul.f32 1.0614054, %v3883_v53  ;;  %v3885_v22 = vpop.eup %3884 }
 0xcac   :  { %v1366_v56 = vadd.f32 -1.4531521, %v1364_v12  ;;  %v3887_v26 = vpop.eup %3886 }
 0xcad   :  { %v1365_v59 = vadd.f32 -1.4531521, %v1363_v55 }
 0xcae   :  { %v1368_v63 = vmul.f32 %v3881_v14, %v1366_v56 }
 0xcaf   :  { %v1367_v3 = vmul.f32 %v3883_v53, %v1365_v59 }
 0xcb0   :  { %v1370_v4 = vadd.f32 1.4214138, %v1368_v63  ;;  %v3015_v63 = vld [vmem:[%s4673_s5 + $0x28] sm:$0xff] }
 0xcb1   :  { %v1369_v5 = vadd.f32 1.4214138, %v1367_v3  ;;  %v3016_v3 = vld [vmem:[%s4673_s5 + $0x30] sm:$0xff] }
 0xcb2   :  { %v1372_v7 = vmul.f32 %v3881_v14, %v1370_v4  ;;  %v3017_v4 = vld [vmem:[%s4673_s5 + $0x38] sm:$0xff] }
 0xcb3   :  { %v1371_v10 = vmul.f32 %v3883_v53, %v1369_v5  ;;  %v3641_v5 = vpack.c.bf16 %v3017_v4, %v3016_v3 }
 0xcb4   :  { %v1374_v11 = vadd.f32 -0.28449672, %v1372_v7 }
 0xcb5   :  { %v1373_v13 = vadd.f32 -0.28449672, %v1371_v10 }
 0xcb6   :  { %v1376_v16 = vmul.f32 %v3881_v14, %v1374_v11 }
 0xcb7   :  { %v1375_v17 = vmul.f32 %v3883_v53, %v1373_v13 }
 0xcb8   :  { %v1378_v18 = vadd.f32 0.2548296, %v1376_v16 }
 0xcb9   :  { %v1377_v21 = vadd.f32 0.2548296, %v1375_v17 }
 0xcba   :  { %v1380_v20 = vmul.f32 %v3881_v14, %v1378_v18  ;;  %v4397_v18 = vld [vmem:[%s4672_s4 + $0x8] sm:$0xff] }
 0xcbb   :  { %v1379_v24 = vmul.f32 %v3883_v53, %v1377_v21  ;;  %v1529_v21 = vrot.slane %v4397_v18, %v4111_v60 }
 0xcbc   :  { %v1390_v27 = vmul.f32 %v3885_v22, %v1380_v20 }
 0xcbd   :  { %v1389_v28 = vmul.f32 %v3887_v26, %v1379_v24 }
 0xcbe   :  { %v1392_v29 = vsub.f32 1.0, %v1390_v27  ;;  %v1535_v27 = vrot.slane %v4397_v18, %v4119_v62 }
 0xcbf   :  { %v1391_v30 = vsub.f32 1.0, %v1389_v28 }
 0xcc0   :  { %v1396_v31 = vsub.f32 0.0, %v1392_v29 }
 0xcc1   :  { %v1395_v32 = vsub.f32 0.0, %v1391_v30 }
 0xcc2   :  { %v1398_v33 = vsel %vm1394_vm10, %v1396_v31, %v1392_v29 }
 0xcc3   :  { %v1400_v34 = vadd.f32 1.0, %v1398_v33  ;;  %v1397_v36 = vsel %vm1393_vm11, %v1395_v32, %v1391_v30  ;;  %v1546_v32 = vrot.slane %v4397_v18, %v4134_v9 }
 0xcc4   :  { %v1399_v39 = vadd.f32 1.0, %v1397_v36 }
 0xcc5   :  { %v1402_v45 = vmul.f32 %v1400_v34, %v1352_v43 }
 0xcc6   :  { %v1401_v44 = vmul.f32 %v1399_v39, %v1351_v37 }
 0xcc8   :  { %3379 = vmatprep.mubr.f32.mxu1 %v1401_v44 }
 0xcc9   :  { %3380 = vmatmul.mubr.f32.vlgmr.msra.gmra.mrb[10].mxu1 %v1402_v45 }
 0xd9c   :  { %v3381_v47 = vpop.f32.mrb[10].mxu1 }
 0xd9d   :  { %v1495_v6 = vadd.f32 %v3381_v47, %v1422_v46  ;;  %v1489_v48 = vpop.f32.mrb[11].mxu1 }
 0xd9e   :  { %v1490_v49 = vadd.f32 %v1489_v48, %v1422_v46 }
 0xd9f   :  { %v1499_v42 = vadd.f32 %v1495_v6, %v4314_v1 }
 0xda0   :  { %v1498_v8 = vadd.f32 %v1490_v49, %v4312_v0  ;;  %v3014_v0 = vld [vmem:[%s4673_s5 + $0x20] sm:$0xff] }
 0xda1   :  { %v1503_v38 = vsel %vm156_vm4, %v1499_v42, 0.0  ;;  %v3637_v2 = vpack.c.bf16 %v3015_v63, %v3014_v0 }
 0xda2   :  { %1504 = vadd.xlane.f32.xlu1 %v1503_v38  ;;  %v1500_v14 = vsel %vm156_vm4, %v1498_v8, 0.0 }
 0xda3   :  { %1501 = vadd.xlane.f32.xlu0 %v1500_v14  ;;  %3638 = vmatprep.subr.bf16.mxu0 %v3637_v2 }
 0xda4   :  { %3640 = vmatpush3.bf16.msra.mxu0 %v3637_v2 }
 0xda5   :  { %3642 = vmatprep.subr.bf16.mxu0 %v3641_v5 }
 0xda8   :  { %3644 = vmatpush3.bf16.msra.mxu0 %v3641_v5 }
 0xe2f   :  { %v1505_v50 = vpop.xlane.xlu1 %1504 }
 0xe30   :  { %v1507_v53 = vmul.f32 0.03125, %v1505_v50  ;;  %v1502_v12 = vpop.xlane.xlu0 %1501 }
 0xe31   :  { %v1506_v54 = vmul.f32 0.03125, %v1502_v12 }
 0xe32   :  { %v1509_v55 = vsub.f32 %v1499_v42, %v1507_v53 }
 0xe33   :  { %v1508_v61 = vsub.f32 %v1498_v8, %v1506_v54 }
 0xe34   :  { %v1511_v56 = vmul.f32 %v1509_v55, %v1509_v55 }
 0xe35   :  { %v1510_v57 = vmul.f32 %v1508_v61, %v1508_v61 }
 0xe36   :  { %v1515_v59 = vsel %vm156_vm4, %v1511_v56, 0.0 }
 0xe37   :  { %1516 = vadd.xlane.f32.xlu1 %v1515_v59  ;;  %v1512_v1 = vsel %vm156_vm4, %v1510_v57, 0.0 }
 0xe38   :  { %1513 = vadd.xlane.f32.xlu0 %v1512_v1 }
 0xec4   :  { %v1517_v7 = vpop.xlane.xlu1 %1516 }
 0xec5   :  { %v1519_v10 = vmul.f32 0.03125, %v1517_v7  ;;  %v1514_v11 = vpop.xlane.xlu0 %1513 }
 0xec6   :  { %v1518_v13 = vmul.f32 0.03125, %v1514_v11 }
 0xec7   :  { %v1521_v16 = vadd.f32 1e-12, %v1519_v10 }
 0xec8   :  { %v1520_v17 = vadd.f32 1e-12, %v1518_v13 }
 0xec9   :  { %3888 = vrsqrt.f32 %v1521_v16 }
 0xeca   :  { %3890 = vrsqrt.f32 %v1520_v17 }
 0xed3   :  { %v3889_v20 = vpop.eup %3888 }
 0xed4   :  { %v3891_v22 = vpop.eup %3890  ;;  %v1525_v24 = vmul.f32 %v3889_v20, %v1509_v55 }
 0xed5   :  { %v1524_v26 = vmul.f32 %v3891_v22, %v1508_v61 }
 0xed6   :  { %v1531_v28 = vmul.f32 %v1529_v21, %v1525_v24 }
 0xed7   :  { %v1530_v29 = vmul.f32 %v1529_v21, %v1524_v26 }
 0xed8   :  { %v4405_v31 = vadd.f32 %v1535_v27, %v1531_v28 }
 0xed9   :  { %v4403_v30 = vadd.f32 %v1535_v27, %v1530_v29 }
 0xedb   :  { %3390 = vmatprep.mubr.msk.f32.mxu0 %vm156_vm4, %v4403_v30 }
 0xedc   :  { %3391 = vmatmul.mubr.msk.f32.vlgmr.msra.gmra.mrb[14].mxu0 %vm156_vm4, %v4405_v31 }
 0xfaf   :  { %v3392_v33 = vpop.f32.mrb[14].mxu0 }
 0xfb0   :  { %v4413_v34 = vadd.f32 %v3392_v33, %v1546_v32  ;;  %v1619_v36 = vpop.f32.mrb[15].mxu0 }
 0xfb1   :  { %v4415_v37 = vadd.f32 %v1619_v36, %v1546_v32 }
 0xfb3   :  { %3397 = vmatprep.mubr.msk.f32.mxu0 %vm203_vm5, %v4415_v37  ;;  %v4421_v39 = vpack.i.bf16 %v4413_v34, %v4415_v37 }
 0xfb5   :  { %3801 = vrot.lane.b32.xlu0 %v4421_v39, %s3967_s14 }
 0xfb9   :  { %3811 = vrot.lane.b32.xlu0 %v4421_v39, %s3968_s15 }
 0xfbd   :  { %1826 = vrot.lane.b32.xlu0 %v4415_v37, %s3966_s13 }
 0xfc1   :  { %3816 = vrot.lane.b32.xlu0 %v4421_v39, %s3969_s16 }
 0xfc5   :  { %1828 = vrot.lane.b32.xlu0 %v4413_v34, %s3966_s13 }
 0xfc9   :  { %2028 = vrot.lane.b32.xlu0 %v4413_v34, %s3970_s19 }
0x1027   :  { %v3802_v43 = vpop.permute.xlu0 %3801 }
0x1028   :  { %v3804_v44 = vunpack.i.h.bf16 %v3802_v43  ;;  %v3803_v45 = vunpack.i.l.bf16 %v3802_v43 }
0x102a   :  { %v3645_v46 = vpack.c.bf16 %v3804_v44, %v3803_v45 }
0x102b   :  { %v3812_v47 = vpop.permute.xlu0 %3811 }
0x102c   :  { %3647 = vmatprep.subr.msk.bf16.mxu0 %vm4169_vm7, %v3645_v46  ;;  %v3814_v11 = vunpack.i.h.bf16 %v3812_v47  ;;  %v3813_v13 = vunpack.i.l.bf16 %v3812_v47 }
0x102d   :  { %3650 = vmatpush3.bf16.xpose.msk.msra.mxu0 %vm4169_vm7, %v3645_v46 }
0x102e   :  { %v3655_v22 = vpack.c.bf16 %v3814_v11, %v3813_v13 }
0x102f   :  { %v1827_v6 = vpop.permute.xlu0 %1826 }
0x1033   :  { %v3817_v48 = vpop.permute.xlu0 %3816 }
0x1034   :  { %v3819_v49 = vunpack.i.h.bf16 %v3817_v48  ;;  %v3818_v42 = vunpack.i.l.bf16 %v3817_v48  ;;  %3398 = vmatmul.mubr.msk.f32.vlgmr.msra.gmra.mrb[16].mxu0 %vm203_vm5, %v4413_v34 }
0x1036   :  { %v3665_v8 = vpack.c.bf16 %v3819_v49, %v3818_v42 }
0x1037   :  { %v1829_v7 = vpop.permute.xlu0 %1828 }
0x1038   :  { %3667 = vmatprep.subr.msk.bf16.mxu1 %vm4169_vm7, %v3665_v8 }
0x1039   :  { %3670 = vmatpush3.bf16.xpose.msk.msra.mxu1 %vm4169_vm7, %v3665_v8 }
0x103b   :  { %v2029_v24 = vpop.permute.xlu0 %2028 }
0x1107   :  { %v3399_v38 = vpop.f32.mrb[16].mxu0 }
0x1108   :  { %v1708_v14 = vpop.f32.mrb[17].mxu0  ;;  %v1714_v53 = vadd.f32 %v3399_v38, %v4193_v40 }
0x1109   :  { %v1709_v50 = vadd.f32 %v1708_v14, %v4196_v41 }
0x110a   :  { %v1720_v54 = vsel %vm392_vm8, %v1714_v53, -inf }
0x110b   :  { %v1717_v12 = vsel %vm392_vm8, %v1709_v50, -inf }
0x110c   :  { %1718 = vmax.xlane.f32.xlu1 %v1717_v12 }
0x1110   :  { %1721 = vmax.xlane.f32.xlu1 %v1720_v54 }
0x1199   :  { %v1719_v55 = vpop.xlane.xlu1 %1718 }
0x119a   :  { %v1723_v61 = vsub.f32 %v1709_v50, %v1719_v55 }
0x119c   :  { %v1725_v59 = vmul.f32 1.442695, %v1723_v61 }
0x119d   :  { %v1722_v56 = vpop.xlane.xlu1 %1721 }
0x119e   :  { %v1724_v57 = vsub.f32 %v1714_v53, %v1722_v56 }
0x11a0   :  { %v1727_v1 = vmul.f32 1.442695, %v1724_v57 }
0x11a2   :  { %3892 = vpow2.f32 %v1727_v1 }
0x11a3   :  { %3894 = vpow2.f32 %v1725_v59 }
0x11ac   :  { %v3893_v0 = vpop.eup %3892 }
0x11ad   :  { %v1732_v63 = vsel %vm392_vm8, %v3893_v0, 0.0  ;;  %v3895_v2 = vpop.eup %3894 }
0x11ae   :  { %1733 = vadd.xlane.f32.xlu1 %v1732_v63  ;;  %v1729_v3 = vsel %vm392_vm8, %v3895_v2, 0.0 }
0x11b2   :  { %1730 = vadd.xlane.f32.xlu1 %v1729_v3 }
0x11c3   :  { %3806 = vrot.lane.b32.xlu1 %v4421_v39, %s3973_s1 }
0x11c7   :  { %2026 = vrot.lane.b32.xlu1 %v4415_v37, %s3970_s19 }
0x123b   :  { %v1734_v4 = vpop.xlane.xlu1 %1733 }
0x123c   :  { %3896 = vrcp.f32 %v1734_v4 }
0x123f   :  { %v1731_v5 = vpop.xlane.xlu1 %1730 }
0x1240   :  { %3898 = vrcp.f32 %v1731_v5 }
0x1243   :  { %v3807_v10 = vpop.permute.xlu1 %3806 }
0x1244   :  { %v3809_v16 = vunpack.i.h.bf16 %v3807_v10  ;;  %v3808_v17 = vunpack.i.l.bf16 %v3807_v10 }
0x1246   :  { %v3651_v21 = vpack.c.bf16 %v3809_v16, %v3808_v17  ;;  %v3897_v26 = vpop.eup %3896 }
0x1247   :  { %v2027_v20 = vpop.permute.xlu1 %2026  ;;  %v1738_v29 = vmul.f32 %v3897_v26, %v3893_v0 }
0x1248   :  { %3652 = vmatprep.subr.bf16.mxu0 %v3651_v21  ;;  %3425 = vmatprep.mubr.msk.f32.mxu1 %vm203_vm5, %v2027_v20 }
0x1249   :  { %3654 = vmatpush3.bf16.msra.mxu0 %v3651_v21  ;;  %3426 = vmatmul.mubr.msk.f32.vlgmr.msra.gmra.mrb[12].mxu1 %vm203_vm5, %v2029_v24 }
0x124a   :  { %v3899_v27 = vpop.eup %3898  ;;  %3657 = vmatprep.subr.msk.bf16.mxu0 %vm4169_vm7, %v3655_v22 }
0x124b   :  { %v1737_v28 = vmul.f32 %v3899_v27, %v3895_v2 }
0x124d   :  { %3404 = vmatprep.mubr.msk.f32.mxu0 %vm392_vm8, %v1737_v28 }
0x124e   :  { %3405 = vmatmul.mubr.msk.f32.vlgmr.msra.gmra.mrb[18].mxu0 %vm392_vm8, %v1738_v29 }
0x124f   :  { %3411 = vmatprep.mubr.msk.f32.mxu0 %vm203_vm5, %v1827_v6 }
0x1252   :  { %3660 = vmatpush3.bf16.xpose.msk.msra.mxu0 %vm4169_vm7, %v3655_v22 }
0x1259   :  { %3412 = vmatmul.mubr.msk.f32.vlgmr.msra.gmra.mrb[20].mxu0 %vm203_vm5, %v1829_v7 }
0x131c   :  { %v3427_v32 = vpop.f32.mrb[12].mxu1 }
0x131d   :  { %v2108_v33 = vpop.f32.mrb[13].mxu1  ;;  %v2114_v49 = vadd.f32 %v3427_v32, %v4193_v40 }
0x131e   :  { %v2109_v48 = vadd.f32 %v2108_v33, %v4196_v41 }
0x131f   :  { %v2120_v38 = vsel %vm392_vm8, %v2114_v49, -inf }
0x1320   :  { %v2117_v8 = vsel %vm392_vm8, %v2109_v48, -inf }
0x1321   :  { %v4465_v36 = vpop.f32.mrb[18].mxu0 }
0x1322   :  { %v4467_v43 = vpop.f32.mrb[19].mxu0 }
0x132c   :  { %v3413_v44 = vpop.f32.mrb[20].mxu0 }
0x132d   :  { %v1914_v45 = vadd.f32 %v3413_v44, %v4193_v40  ;;  %v1908_v46 = vpop.f32.mrb[21].mxu0 }
0x132e   :  { %v1909_v47 = vadd.f32 %v1908_v46, %v4196_v41 }
0x132f   :  { %v1920_v6 = vsel %vm392_vm8, %v1914_v45, -inf }
0x1330   :  { %1921 = vmax.xlane.f32.xlu0 %v1920_v6  ;;  %v1917_v42 = vsel %vm392_vm8, %v1909_v47, -inf }
0x1331   :  { %1918 = vmax.xlane.f32.xlu1 %v1917_v42 }
0x1334   :  { %2118 = vmax.xlane.f32.xlu0 %v2117_v8 }
0x1335   :  { %2121 = vmax.xlane.f32.xlu1 %v2120_v38 }
0x13bd   :  { %v1922_v14 = vpop.xlane.xlu0 %1921 }
0x13be   :  { %v1919_v50 = vpop.xlane.xlu1 %1918  ;;  %v1924_v12 = vsub.f32 %v1914_v45, %v1922_v14 }
0x13bf   :  { %v1923_v53 = vsub.f32 %v1909_v47, %v1919_v50 }
0x13c0   :  { %v1927_v1 = vmul.f32 1.442695, %v1924_v12 }
0x13c1   :  { %v2119_v54 = vpop.xlane.xlu0 %2118  ;;  %v1925_v57 = vmul.f32 1.442695, %v1923_v53 }
0x13c2   :  { %v2123_v55 = vsub.f32 %v2109_v48, %v2119_v54  ;;  %v2122_v61 = vpop.xlane.xlu1 %2121 }
0x13c3   :  { %v2124_v56 = vsub.f32 %v2114_v49, %v2122_v61 }
0x13c4   :  { %v2125_v59 = vmul.f32 1.442695, %v2123_v55 }
0x13c5   :  { %v2127_v0 = vmul.f32 1.442695, %v2124_v56 }
0x13c6   :  { %3900 = vpow2.f32 %v2125_v59 }
0x13c7   :  { %3902 = vpow2.f32 %v2127_v0 }
0x13c8   :  { %3904 = vpow2.f32 %v1925_v57 }
0x13c9   :  { %3906 = vpow2.f32 %v1927_v1 }
0x13d0   :  { %v3901_v63 = vpop.eup %3900 }
0x13d1   :  { %v3903_v2 = vpop.eup %3902  ;;  %v2129_v3 = vsel %vm392_vm8, %v3901_v63, 0.0 }
0x13d2   :  { %v3905_v4 = vpop.eup %3904  ;;  %2130 = vadd.xlane.f32.xlu0 %v2129_v3  ;;  %v2132_v5 = vsel %vm392_vm8, %v3903_v2, 0.0 }
0x13d3   :  { %v3907_v7 = vpop.eup %3906  ;;  %2133 = vadd.xlane.f32.xlu1 %v2132_v5  ;;  %v1929_v10 = vsel %vm392_vm8, %v3905_v4, 0.0 }
0x13d4   :  { %v1932_v11 = vsel %vm392_vm8, %v3907_v7, 0.0 }
0x13d6   :  { %1930 = vadd.xlane.f32.xlu0 %v1929_v10 }
0x13d7   :  { %1933 = vadd.xlane.f32.xlu1 %v1932_v11 }
0x13e8   :  { %3826 = vrot.lane.b32.xlu1 %v4421_v39, %s3974_s21 }
0x13ec   :  { %3821 = vrot.lane.b32.xlu0 %v4421_v39, %s3976_s2  ;;  %3831 = vrot.lane.b32.xlu1 %v4421_v39, %s3975_s22 }
0x13f0   :  { %2226 = vrot.lane.b32.xlu0 %v4415_v37, %s3977_s23  ;;  %2228 = vrot.lane.b32.xlu1 %v4413_v34, %s3977_s23 }
0x145f   :  { %v2131_v13 = vpop.xlane.xlu0 %2130 }
0x1460   :  { %v2134_v16 = vpop.xlane.xlu1 %2133  ;;  %3908 = vrcp.f32 %v2131_v13 }
0x1463   :  { %v1931_v17 = vpop.xlane.xlu0 %1930 }
0x1464   :  { %3910 = vrcp.f32 %v1931_v17  ;;  %v1934_v21 = vpop.xlane.xlu1 %1933 }
0x1465   :  { %3912 = vrcp.f32 %v1934_v21 }
0x1466   :  { %3914 = vrcp.f32 %v2134_v16 }
0x1467   :  { %v3822_v20 = vpop.permute.xlu0 %3821 }
0x1468   :  { %v3824_v22 = vunpack.i.h.bf16 %v3822_v20  ;;  %v3823_v24 = vunpack.i.l.bf16 %v3822_v20  ;;  %v3827_v26 = vpop.permute.xlu1 %3826 }
0x1469   :  { %v3829_v27 = vunpack.i.h.bf16 %v3827_v26  ;;  %v3828_v28 = vunpack.i.l.bf16 %v3827_v26  ;;  %v3044_v26 = vld [vmem:[%s4674_s6 + $0x20] sm:$0xff] }
0x146a   :  { %v3661_v29 = vpack.c.bf16 %v3824_v22, %v3823_v24  ;;  %v3909_v33 = vpop.eup %3908 }
0x146b   :  { %v3671_v32 = vpack.c.bf16 %v3829_v27, %v3828_v28  ;;  %v2137_v49 = vmul.f32 %v3909_v33, %v3901_v63  ;;  %v2227_v38 = vpop.permute.xlu0 %2226  ;;  %v3045_v27 = vld [vmem:[%s4674_s6 + $0x28] sm:$0xff]  ;;  %v3046_v28 = vld [vmem:[%s4674_s6 + $0x30] sm:$0xff] }
0x146c   :  { %3662 = vmatprep.subr.bf16.mxu0 %v3661_v29  ;;  %v3832_v37 = vpop.permute.xlu1 %3831 }
0x146d   :  { %3664 = vmatpush3.bf16.msra.mxu0 %v3661_v29  ;;  %v3834_v44 = vunpack.i.h.bf16 %v3832_v37  ;;  %v3833_v45 = vunpack.i.l.bf16 %v3832_v37  ;;  %v3685_v29 = vpack.c.bf16 %v3045_v27, %v3044_v26 }
0x146e   :  { %v3911_v34 = vpop.eup %3910  ;;  %3672 = vmatprep.subr.bf16.mxu0 %v3671_v32 }
0x146f   :  { %v3913_v46 = vpop.eup %3912  ;;  %v1937_v47 = vmul.f32 %v3911_v34, %v3905_v4  ;;  %v3675_v42 = vpack.c.bf16 %v3834_v44, %v3833_v45 }
0x1470   :  { %v1938_v48 = vmul.f32 %v3913_v46, %v3907_v7  ;;  %v3915_v6 = vpop.eup %3914  ;;  %v2229_v14 = vpop.permute.xlu1 %2228 }
0x1471   :  { %3418 = vmatprep.mubr.msk.f32.mxu0 %vm392_vm8, %v1937_v47  ;;  %v2138_v8 = vmul.f32 %v3915_v6, %v3903_v2 }
0x1472   :  { %3419 = vmatmul.mubr.msk.f32.vlgmr.msra.gmra.mrb[22].mxu0 %vm392_vm8, %v1938_v48 }
0x1473   :  { %3674 = vmatpush3.bf16.msra.mxu0 %v3671_v32  ;;  %3432 = vmatprep.mubr.msk.f32.mxu0 %vm392_vm8, %v2137_v49  ;;  %v3047_v32 = vld [vmem:[%s4674_s6 + $0x38] sm:$0xff] }
0x1474   :  { %3677 = vmatprep.subr.msk.bf16.mxu0 %vm4169_vm7, %v3675_v42  ;;  %v3689_v37 = vpack.c.bf16 %v3047_v32, %v3046_v28  ;;  %v2583_v28 = vrot.slane %v4397_v18, %v1258_v52  ;;  %v3057_v52 = vld [vmem:[%s4676_s8 + $0x88] sm:$0xff] }
0x1476   :  { %3433 = vmatmul.mubr.msk.f32.vlgmr.msra.gmra.mrb[24].mxu0 %vm392_vm8, %v2138_v8 }
0x1477   :  { %3439 = vmatprep.mubr.msk.f32.mxu0 %vm203_vm5, %v2227_v38 }
0x147c   :  { %3680 = vmatpush3.bf16.xpose.msk.msra.mxu0 %vm4169_vm7, %v3675_v42 }
0x1483   :  { %3440 = vmatmul.mubr.msk.f32.vlgmr.msra.gmra.mrb[26].mxu0 %vm203_vm5, %v2229_v14 }
0x1545   :  { %v3420_v50 = vpop.f32.mrb[22].mxu0 }
0x1546   :  { %v2017_v53 = vpop.f32.mrb[23].mxu0 }
0x1549   :  { %v3434_v12 = vpop.f32.mrb[24].mxu0 }
0x154a   :  { %v2217_v54 = vpop.f32.mrb[25].mxu0 }
0x1556   :  { %v3441_v55 = vpop.f32.mrb[26].mxu0 }
0x1557   :  { %v2314_v61 = vadd.f32 %v3441_v55, %v4193_v40  ;;  %v2308_v56 = vpop.f32.mrb[27].mxu0 }
0x1558   :  { %v2309_v57 = vadd.f32 %v2308_v56, %v4196_v41 }
0x1559   :  { %v2320_v59 = vsel %vm392_vm8, %v2314_v61, -inf }
0x155a   :  { %2321 = vmax.xlane.f32.xlu1 %v2320_v59  ;;  %v2317_v1 = vsel %vm392_vm8, %v2309_v57, -inf }
0x155b   :  { %2318 = vmax.xlane.f32.xlu0 %v2317_v1 }
0x156b   :  { %3836 = vrot.lane.b32.xlu1 %v4421_v39, %s3978_s24 }
0x156f   :  { %2430 = vrot.lane.b32.xlu1 %v3420_v50, %s3972_s20 }
0x1573   :  { %2436 = vrot.lane.b32.xlu1 %v2217_v54, %s3979_s3 }
0x15e7   :  { %v2322_v23 = vpop.xlane.xlu1 %2321 }
0x15e8   :  { %v2324_v0 = vsub.f32 %v2314_v61, %v2322_v23  ;;  %v2319_v63 = vpop.xlane.xlu0 %2318 }
0x15e9   :  { %v2323_v40 = vsub.f32 %v2309_v57, %v2319_v63 }
0x15ea   :  { %v2327_v2 = vmul.f32 1.442695, %v2324_v0 }
0x15eb   :  { %v2325_v3 = vmul.f32 1.442695, %v2323_v40  ;;  %v3837_v41 = vpop.permute.xlu1 %3836 }
0x15ec   :  { %v3839_v4 = vunpack.i.h.bf16 %v3837_v41  ;;  %v3838_v5 = vunpack.i.l.bf16 %v3837_v41  ;;  %v3051_v41 = vld [vmem:[%s4675_s7 + $0x28] sm:$0xff] }
0x15ed   :  { %3916 = vpow2.f32 %v2325_v3 }
0x15ee   :  { %v3681_v7 = vpack.c.bf16 %v3839_v4, %v3838_v5  ;;  %3918 = vpow2.f32 %v2327_v2  ;;  %v3052_v5 = vld [vmem:[%s4675_s7 + $0x30] sm:$0xff] }
0x15ef   :  { %v2431_v45 = vpop.permute.xlu1 %2430 }
0x15f0   :  { %3682 = vmatprep.subr.bf16.mxu1 %v3681_v7  ;;  %v2451_v49 = vsel %vm203_vm5, %v4465_v36, %v2431_v45  ;;  %v3059_v45 = vld [vmem:[%s4676_s8 + $0x98] sm:$0xff] }
0x15f1   :  { %3684 = vmatpush3.bf16.msra.mxu1 %v3681_v7  ;;  %v3053_v7 = vld [vmem:[%s4675_s7 + $0x38] sm:$0xff] }
0x15f2   :  { %3686 = vmatprep.subr.bf16.mxu1 %v3685_v29 }
0x15f3   :  { %v2437_v47 = vpop.permute.xlu1 %2436 }
0x15f7   :  { %v3917_v10 = vpop.eup %3916 }
0x15f8   :  { %v2329_v39 = vsel %vm392_vm8, %v3917_v10, 0.0  ;;  %v3919_v11 = vpop.eup %3918 }
0x15f9   :  { %2330 = vadd.xlane.f32.xlu0 %v2329_v39  ;;  %v2332_v13 = vsel %vm392_vm8, %v3919_v11, 0.0 }
0x15fd   :  { %2333 = vadd.xlane.f32.xlu0 %v2332_v13 }
0x1613   :  { %2428 = vrot.lane.b32.xlu0 %v2017_v53, %s3972_s20 }
0x1617   :  { %2438 = vrot.lane.b32.xlu0 %v3434_v12, %s3979_s3 }
0x1686   :  { %v2331_v16 = vpop.xlane.xlu0 %2330 }
0x1687   :  { %3920 = vrcp.f32 %v2331_v16 }
0x168a   :  { %v2334_v17 = vpop.xlane.xlu0 %2333 }
0x168b   :  { %3922 = vrcp.f32 %v2334_v17 }
0x168e   :  { %v2429_v44 = vpop.permute.xlu0 %2428 }
0x168f   :  { %v2450_v48 = vsel %vm203_vm5, %v4467_v43, %v2429_v44  ;;  %v2464_v43 = vrot.slane %v4397_v18, %v1139_v19  ;;  %v3058_v44 = vld [vmem:[%s4676_s8 + $0x90] sm:$0xff] }
0x1690   :  { %v2452_v8 = vsel %vm392_vm8, %v2450_v48, %v2437_v47  ;;  %v3060_v47 = vld [vmem:[%s4676_s8 + $0xa0] sm:$0xff]  ;;  %v3061_v48 = vld [vmem:[%s4676_s8 + $0xa8] sm:$0xff] }
0x1691   :  { %v3921_v21 = vpop.eup %3920 }
0x1692   :  { %v2337_v20 = vmul.f32 %v3921_v21, %v3917_v10  ;;  %v2439_v46 = vpop.permute.xlu0 %2438  ;;  %v3697_v10 = vpack.c.bf16 %v3053_v7, %v3052_v5 }
0x1693   :  { %v2453_v38 = vsel %vm392_vm8, %v2451_v49, %v2439_v46  ;;  %v3705_v46 = vpack.c.bf16 %v3059_v45, %v3058_v44  ;;  %v3062_v49 = vld [vmem:[%s4676_s8 + $0xb0] sm:$0xff] }
0x1694   :  { %3446 = vmatprep.mubr.msk.f32.mxu1 %vm392_vm8, %v2337_v20  ;;  %v2577_v20 = vrot.slane %v4397_v18, %v1252_v51  ;;  %v3056_v51 = vld [vmem:[%s4676_s8 + $0x80] sm:$0xff] }
0x1695   :  { %v3923_v22 = vpop.eup %3922 }
0x1696   :  { %v2338_v24 = vmul.f32 %v3923_v22, %v3919_v11 }
0x1698   :  { %3447 = vmatmul.mubr.msk.f32.vlgmr.msra.gmra.mrb[14].mxu1 %vm392_vm8, %v2338_v24 }
0x1699   :  { %3688 = vmatpush3.bf16.msra.mxu1 %v3685_v29 }
0x169a   :  { %3690 = vmatprep.subr.bf16.mxu1 %v3689_v37 }
0x169d   :  { %3692 = vmatpush3.bf16.msra.mxu1 %v3689_v37 }
0x176b   :  { %v3448_v33 = vpop.f32.mrb[14].mxu1 }
0x176c   :  { %2446 = vrot.lane.b32.xlu0 %v3448_v33, %s3980_s12  ;;  %v2417_v34 = vpop.f32.mrb[15].mxu1 }
0x176d   :  { %2444 = vrot.lane.b32.xlu1 %v2417_v34, %s3980_s12  ;;  %v3701_v34 = vpack.c.bf16 %v3057_v52, %v3056_v51 }
0x176f   :  { %3702 = vmatprep.subr.bf16.mxu1 %v3701_v34 }
0x17de   :  { %v2447_v6 = vpop.permute.xlu0 %2446 }
0x17df   :  { %v2445_v42 = vpop.permute.xlu1 %2444  ;;  %v2455_v50 = vsel %vm1130_vm9, %v2453_v38, %v2447_v6  ;;  %v3709_v6 = vpack.c.bf16 %v3061_v48, %v3060_v47  ;;  %v3064_v38 = vld [vmem:[%s4676_s8 + $0xc0] sm:$0xff] }
0x17e0   :  { %v2454_v14 = vsel %vm1130_vm9, %v2452_v8, %v2445_v42  ;;  %v3063_v42 = vld [vmem:[%s4676_s8 + $0xb8] sm:$0xff] }
0x17e1   :  { %3457 = vmatprep.mubr.msk.f32.mxu1 %vm156_vm4, %v2454_v14  ;;  %v3713_v8 = vpack.c.bf16 %v3063_v42, %v3062_v49  ;;  %v3065_v14 = vld [vmem:[%s4676_s8 + $0xc8] sm:$0xff] }
0x17e2   :  { %3458 = vmatmul.mubr.msk.f32.vlgmr.msra.gmra.mrb[16].mxu1 %vm156_vm4, %v2455_v50  ;;  %v3717_v50 = vpack.c.bf16 %v3065_v14, %v3064_v38 }
0x17e3   :  { %3704 = vmatpush3.bf16.msra.mxu1 %v3701_v34 }
0x17e4   :  { %3706 = vmatprep.subr.bf16.mxu1 %v3705_v46 }
0x17e7   :  { %3708 = vmatpush3.bf16.msra.mxu1 %v3705_v46 }
0x17e8   :  { %3710 = vmatprep.subr.bf16.mxu1 %v3709_v6 }
0x17eb   :  { %3712 = vmatpush3.bf16.msra.mxu1 %v3709_v6 }
0x17ec   :  { %3714 = vmatprep.subr.bf16.mxu1 %v3713_v8 }
0x17ef   :  { %3716 = vmatpush3.bf16.msra.mxu1 %v3713_v8 }
0x17f0   :  { %3718 = vmatprep.subr.bf16.mxu1 %v3717_v50 }
0x17f3   :  { %3720 = vmatpush3.bf16.msra.mxu1 %v3717_v50 }
0x18b5   :  { %v3459_v53 = vpop.f32.mrb[16].mxu1 }
0x18b6   :  { %v2543_v12 = vadd.f32 %v3459_v53, %v2464_v43  ;;  %v2537_v36 = vpop.f32.mrb[17].mxu1  ;;  %v3067_v53 = vld [vmem:[%s4676_s8 + $0xd8] sm:$0xff] }
0x18b7   :  { %v2538_v54 = vadd.f32 %v2537_v36, %v2464_v43  ;;  %v3066_v43 = vld [vmem:[%s4676_s8 + $0xd0] sm:$0xff]  ;;  %v3068_v36 = vld [vmem:[%s4676_s8 + $0xe0] sm:$0xff] }
0x18b8   :  { %v2547_v55 = vadd.f32 %v2543_v12, %v4405_v31  ;;  %v3721_v12 = vpack.c.bf16 %v3067_v53, %v3066_v43 }
0x18b9   :  { %v2546_v61 = vadd.f32 %v2538_v54, %v4403_v30  ;;  %v3050_v30 = vld [vmem:[%s4675_s7 + $0x20] sm:$0xff]  ;;  %v3069_v54 = vld [vmem:[%s4676_s8 + $0xe8] sm:$0xff] }
0x18ba   :  { %v2551_v56 = vsel %vm156_vm4, %v2547_v55, 0.0  ;;  %v3693_v4 = vpack.c.bf16 %v3051_v41, %v3050_v30  ;;  %3722 = vmatprep.subr.bf16.mxu1 %v3721_v12 }
0x18bb   :  { %2552 = vadd.xlane.f32.xlu0 %v2551_v56  ;;  %v2548_v57 = vsel %vm156_vm4, %v2546_v61, 0.0  ;;  %3724 = vmatpush3.bf16.msra.mxu1 %v3721_v12  ;;  %v3071_v56 = vld [vmem:[%s4676_s8 + $0xf8] sm:$0xff] }
0x18bc   :  { %2549 = vadd.xlane.f32.xlu1 %v2548_v57  ;;  %3694 = vmatprep.subr.bf16.mxu0 %v3693_v4 }
0x18bd   :  { %3696 = vmatpush3.bf16.msra.mxu0 %v3693_v4 }
0x18be   :  { %3698 = vmatprep.subr.bf16.mxu0 %v3697_v10 }
0x18c1   :  { %3700 = vmatpush3.bf16.msra.mxu0 %v3697_v10 }
0x1948   :  { %v2553_v59 = vpop.xlane.xlu0 %2552 }
0x1949   :  { %v2555_v1 = vmul.f32 0.03125, %v2553_v59  ;;  %v2550_v23 = vpop.xlane.xlu1 %2549  ;;  %v2594_v59 = vrot.slane %v4397_v18, %v1268_v35 }
0x194a   :  { %v2554_v0 = vmul.f32 0.03125, %v2550_v23 }
0x194b   :  { %v2557_v63 = vsub.f32 %v2547_v55, %v2555_v1  ;;  %v3725_v55 = vpack.c.bf16 %v3069_v54, %v3068_v36 }
0x194c   :  { %v2556_v19 = vsub.f32 %v2546_v61, %v2554_v0  ;;  %v3070_v61 = vld [vmem:[%s4676_s8 + $0xf0] sm:$0xff] }
0x194d   :  { %v2559_v40 = vmul.f32 %v2557_v63, %v2557_v63  ;;  %3726 = vmatprep.subr.bf16.mxu1 %v3725_v55  ;;  %v3729_v57 = vpack.c.bf16 %v3071_v56, %v3070_v61 }
0x194e   :  { %v2558_v2 = vmul.f32 %v2556_v19, %v2556_v19  ;;  %3728 = vmatpush3.bf16.msra.mxu1 %v3725_v55 }
0x194f   :  { %v2563_v3 = vsel %vm156_vm4, %v2559_v40, 0.0  ;;  %3730 = vmatprep.subr.bf16.mxu1 %v3729_v57 }
0x1950   :  { %2564 = vadd.xlane.f32.xlu1 %v2563_v3  ;;  %v2560_v31 = vsel %vm156_vm4, %v2558_v2, 0.0 }
0x1951   :  { %2561 = vadd.xlane.f32.xlu0 %v2560_v31 }
0x1952   :  { %3732 = vmatpush3.bf16.msra.mxu1 %v3729_v57 }
0x19dd   :  { %v2565_v39 = vpop.xlane.xlu1 %2564 }
0x19de   :  { %v2567_v11 = vmul.f32 0.03125, %v2565_v39  ;;  %v2562_v13 = vpop.xlane.xlu0 %2561 }
0x19df   :  { %v2566_v16 = vmul.f32 0.03125, %v2562_v13 }
0x19e0   :  { %v2569_v17 = vadd.f32 1e-12, %v2567_v11 }
0x19e1   :  { %v2568_v21 = vadd.f32 1e-12, %v2566_v16 }
0x19e2   :  { %3924 = vrsqrt.f32 %v2569_v17 }
0x19e3   :  { %3926 = vrsqrt.f32 %v2568_v21 }
0x19ec   :  { %v3925_v22 = vpop.eup %3924 }
0x19ed   :  { %v3927_v24 = vpop.eup %3926  ;;  %v2573_v26 = vmul.f32 %v3925_v22, %v2557_v63 }
0x19ee   :  { %v2572_v27 = vmul.f32 %v3927_v24, %v2556_v19 }
0x19ef   :  { %v2579_v29 = vmul.f32 %v2577_v20, %v2573_v26 }
0x19f0   :  { %v2578_v32 = vmul.f32 %v2577_v20, %v2572_v27 }
0x19f1   :  { %v4568_v33 = vadd.f32 %v2583_v28, %v2579_v29 }
0x19f2   :  { %v4566_v37 = vadd.f32 %v2583_v28, %v2578_v32 }
0x19f4   :  { %3468 = vmatprep.mubr.msk.f32.mxu0 %vm156_vm4, %v4566_v37 }
0x19f5   :  { %3469 = vmatmul.mubr.msk.f32.vlgmr.msra.gmra.mrb[28].mxu0 %vm156_vm4, %v4568_v33 }
0x19f6   :  { %3514 = vmatprep.mubr.msk.f32.mxu0 %vm3982_vm14, %v3965_v25 }
0x1ac8   :  { %v3470_v1 = vpop.f32.mrb[28].mxu0 }
0x1ac9   :  { %v2673_v23 = vadd.f32 %v3470_v1, %v2594_v59  ;;  %v2667_v0 = vpop.f32.mrb[29].mxu0 }
0x1aca   :  { %v2668_v63 = vadd.f32 %v2667_v0, %v2594_v59  ;;  %v2748_v59 = vrot.slane %v4397_v18, %v1421_v15 }
0x1acb   :  { %v2679_v19 = vmul.f32 0.70710677, %v2673_v23  ;;  %v2677_v61 = vmul.f32 0.5, %v2673_v23 }
0x1acc   :  { %v2678_v40 = vmul.f32 0.70710677, %v2668_v63  ;;  %v2676_v54 = vmul.f32 0.5, %v2668_v63 }
0x1acd   :  { %v2681_v2 = vand.u32 2147483647, %v2679_v19  ;;  %vm2719_vm12 = vcmp.lt.f32.partialorder %v2679_v19, 0.0 }
0x1ace   :  { %v2680_v3 = vand.u32 2147483647, %v2678_v40  ;;  %vm2718_vm13 = vcmp.lt.f32.partialorder %v2678_v40, 0.0 }
0x1acf   :  { %v2683_v31 = vmul.f32 0.3275911, %v2681_v2  ;;  %v2707_v5 = vsub.f32 0.0, %v2681_v2 }
0x1ad0   :  { %v2682_v30 = vmul.f32 0.3275911, %v2680_v3  ;;  %v2706_v7 = vsub.f32 0.0, %v2680_v3 }
0x1ad1   :  { %v2685_v41 = vadd.f32 1.0, %v2683_v31  ;;  %v2709_v39 = vmul.f32 %v2707_v5, %v2681_v2 }
0x1ad2   :  { %v2684_v4 = vadd.f32 1.0, %v2682_v30  ;;  %v2708_v13 = vmul.f32 %v2706_v7, %v2680_v3 }
0x1ad3   :  { %3928 = vrcp.f32 %v2685_v41  ;;  %v2712_v21 = vmul.f32 1.442695, %v2709_v39  ;;  %v2885_v39 = vld [vmem:[%s4677_s9 + $0x10] sm:$0xff] }
0x1ad4   :  { %3930 = vrcp.f32 %v2684_v4  ;;  %v2710_v24 = vmul.f32 1.442695, %v2708_v13  ;;  %v2886_v13 = vld [vmem:[%s4677_s9 + $0x18] sm:$0xff] }
0x1ad5   :  { %3932 = vpow2.f32 %v2712_v21 }
0x1ad6   :  { %3934 = vpow2.f32 %v2710_v24 }
0x1add   :  { %v3929_v10 = vpop.eup %3928 }
0x1ade   :  { %v3931_v11 = vpop.eup %3930  ;;  %v2689_v35 = vmul.f32 1.0614054, %v3929_v10 }
0x1adf   :  { %v2688_v16 = vmul.f32 1.0614054, %v3931_v11  ;;  %v3933_v48 = vpop.eup %3932 }
0x1ae0   :  { %v2691_v17 = vadd.f32 -1.4531521, %v2689_v35  ;;  %v3935_v49 = vpop.eup %3934 }
0x1ae1   :  { %v2690_v20 = vadd.f32 -1.4531521, %v2688_v16  ;;  %v3737_v16 = vpack.c.bf16 %v2886_v13, %v2885_v39 }
0x1ae2   :  { %v2693_v22 = vmul.f32 %v3929_v10, %v2691_v17 }
0x1ae3   :  { %v2692_v26 = vmul.f32 %v3931_v11, %v2690_v20 }
0x1ae4   :  { %v2695_v27 = vadd.f32 1.4214138, %v2693_v22 }
0x1ae5   :  { %v2694_v28 = vadd.f32 1.4214138, %v2692_v26 }
0x1ae6   :  { %v2697_v29 = vmul.f32 %v3929_v10, %v2695_v27  ;;  %v38_v27 = vld [vmem:[%s4672_s4 + $0x10] sm:$0xff]  ;;  %s3983_s4 = smov [#allocation2]  }
0x1ae7   :  { %v2696_v32 = vmul.f32 %v3931_v11, %v2694_v28  ;;  %v2855_v28 = vrot.slane %v38_v27, %v4111_v60 }
0x1ae8   :  { %v2699_v51 = vadd.f32 -0.28449672, %v2697_v29 }
0x1ae9   :  { %v2698_v52 = vadd.f32 -0.28449672, %v2696_v32  ;;  %v2861_v32 = vrot.slane %v38_v27, %v4119_v62 }
0x1aea   :  { %v2701_v34 = vmul.f32 %v3929_v10, %v2699_v51 }
0x1aeb   :  { %v2700_v44 = vmul.f32 %v3931_v11, %v2698_v52 }
0x1aec   :  { %v2703_v45 = vadd.f32 0.2548296, %v2701_v34 }
0x1aed   :  { %v2702_v46 = vadd.f32 0.2548296, %v2700_v44 }
0x1aee   :  { %v2705_v47 = vmul.f32 %v3929_v10, %v2703_v45  ;;  %v2884_v10 = vld [vmem:[%s4677_s9 + $0x8] sm:$0xff] }
0x1aef   :  { %v2704_v6 = vmul.f32 %v3931_v11, %v2702_v46  ;;  %v3981_v11 = vmov 0.0|0.0  }
0x1af0   :  { %v2715_v42 = vmul.f32 %v3933_v48, %v2705_v47  ;;  %3733 = vmatprep.subr.bf16.mxu0 %v3981_v11 }
0x1af1   :  { %v2714_v8 = vmul.f32 %v3935_v49, %v2704_v6 }
0x1af2   :  { %v2717_v38 = vsub.f32 1.0, %v2715_v42 }
0x1af3   :  { %v2716_v14 = vsub.f32 1.0, %v2714_v8 }
0x1af4   :  { %v2721_v50 = vsub.f32 0.0, %v2717_v38 }
0x1af5   :  { %v2720_v43 = vsub.f32 0.0, %v2716_v14 }
0x1af6   :  { %v2723_v53 = vsel %vm2719_vm12, %v2721_v50, %v2717_v38 }
0x1af7   :  { %v2725_v12 = vadd.f32 1.0, %v2723_v53  ;;  %v2722_v36 = vsel %vm2718_vm13, %v2720_v43, %v2716_v14 }
0x1af8   :  { %v2724_v55 = vadd.f32 1.0, %v2722_v36 }
0x1af9   :  { %v2727_v57 = vmul.f32 %v2725_v12, %v2677_v61  ;;  %v2890_v61 = vrot.slane %v38_v27, %v4134_v9 }
0x1afa   :  { %v2726_v56 = vmul.f32 %v2724_v55, %v2676_v54 }
0x1afc   :  { %3503 = vmatprep.mubr.f32.mxu1 %v2726_v56 }
0x1afd   :  { %3504 = vmatmul.mubr.f32.vlgmr.msra.gmra.mrb[18].mxu1 %v2727_v57 }
0x1bd0   :  { %v3505_v1 = vpop.f32.mrb[18].mxu1 }
0x1bd1   :  { %v2821_v0 = vadd.f32 %v3505_v1, %v2748_v59  ;;  %v2815_v2 = vpop.f32.mrb[19].mxu1 }
0x1bd2   :  { %v2816_v19 = vadd.f32 %v2815_v2, %v2748_v59 }
0x1bd3   :  { %v2825_v3 = vadd.f32 %v2821_v0, %v4568_v33 }
0x1bd4   :  { %v2824_v40 = vadd.f32 %v2816_v19, %v4566_v37  ;;  %v2883_v37 = vld [vmem:[%s4677_s9] sm:$0xff]  ;;  %s2971_s9 = sshll.u32 %s3983_s4, 4  ;;  %s2972_s9 = int_to_ptr.vmem [resolvable:$true] %s2971_s9 }
0x1bd5   :  { %v2829_v63 = vsel %vm156_vm4, %v2825_v3, 0.0  ;;  %v3734_v35 = vpack.c.bf16 %v2884_v10, %v2883_v37  ;;  %s3940_s15 = scalar_lea.vmem %s2972_s9, 32  ;;  %p3945_p1 = scmp.lt.s32.totalorder %s2972_s9, %s2972_s9 }
0x1bd6   :  { %2830 = vadd.xlane.f32.xlu1 %v2829_v63  ;;  %v2826_v23 = vsel %vm156_vm4, %v2824_v40, 0.0  ;;  %p3941_p0 = scmp.ne.s32.totalorder %s2972_s9, %s3940_s15  ;;  %p3946_p2 = scmp.lt.s32.totalorder %s3940_s15, %s3940_s15 }
0x1bd7   :  { %2827 = vadd.xlane.f32.xlu0 %v2826_v23  ;;  %3735 = vmatpush3.bf16.msra.mxu0 %v3734_v35 }
0x1bd8   :  { %3736 = vmatprep.subr.bf16.mxu0 %v3981_v11  ;;  %p3947_p3 = por %p3946_p2, %p3945_p1 }
0x1bda   :  { %p3948_p4 = pnand %p3947_p3, %p3941_p0 }
0x1bdb   :  { %3738 = vmatpush3.bf16.msra.mxu0 %v3737_v16 }
0x1c63   :  { %v2831_v31 = vpop.xlane.xlu1 %2830 }
0x1c64   :  { %v2833_v30 = vmul.f32 0.03125, %v2831_v31  ;;  %v2828_v41 = vpop.xlane.xlu0 %2827 }
0x1c65   :  { %v2832_v58 = vmul.f32 0.03125, %v2828_v41 }
0x1c66   :  { %v2835_v4 = vsub.f32 %v2825_v3, %v2833_v30 }
0x1c67   :  { %v2834_v15 = vsub.f32 %v2824_v40, %v2832_v58 }
0x1c68   :  { %v2837_v18 = vmul.f32 %v2835_v4, %v2835_v4 }
0x1c69   :  { %v2836_v5 = vmul.f32 %v2834_v15, %v2834_v15 }
0x1c6a   :  { %v2841_v7 = vsel %vm156_vm4, %v2837_v18, 0.0 }
0x1c6b   :  { %2842 = vadd.xlane.f32.xlu1 %v2841_v7  ;;  %v2838_v33 = vsel %vm156_vm4, %v2836_v5, 0.0 }
0x1c6c   :  { %2839 = vadd.xlane.f32.xlu0 %v2838_v33 }
0x1cf8   :  { %v2843_v17 = vpop.xlane.xlu1 %2842 }
0x1cf9   :  { %v2845_v21 = vmul.f32 0.03125, %v2843_v17  ;;  %v2840_v20 = vpop.xlane.xlu0 %2839 }
0x1cfa   :  { %v2844_v22 = vmul.f32 0.03125, %v2840_v20 }
0x1cfb   :  { %v2847_v24 = vadd.f32 1e-12, %v2845_v21 }
0x1cfc   :  { %v2846_v26 = vadd.f32 1e-12, %v2844_v22 }
0x1cfd   :  { %3936 = vrsqrt.f32 %v2847_v24 }
0x1cfe   :  { %3938 = vrsqrt.f32 %v2846_v26 }
0x1d07   :  { %v3937_v29 = vpop.eup %3936 }
0x1d08   :  { %v3939_v25 = vpop.eup %3938  ;;  %v2851_v51 = vmul.f32 %v3937_v29, %v2835_v4 }
0x1d09   :  { %v2850_v52 = vmul.f32 %v3939_v25, %v2834_v15 }
0x1d0a   :  { %v2857_v34 = vmul.f32 %v2855_v28, %v2851_v51 }
0x1d0b   :  { %v2856_v44 = vmul.f32 %v2855_v28, %v2850_v52 }
0x1d0c   :  { %v2863_v45 = vadd.f32 %v2861_v32, %v2857_v34 }
0x1d0d   :  { %v2862_v46 = vadd.f32 %v2861_v32, %v2856_v44 }
0x1d0e   :  { %v2873_v47 = vsel %vm156_vm4, %v2863_v45, 0.0 }
0x1d0f   :  { %v2864_v48 = vsel %vm156_vm4, %v2862_v46, 0.0  ;;  %v2874_v6 = vrot.slane %v2873_v47, 4 }
0x1d10   :  { %v2865_v49 = vrot.slane %v2864_v48, 4 }
0x1d11   :  { %v2875_v42 = vadd.f32 %v2874_v6, %v2873_v47 }
0x1d12   :  { %v2866_v8 = vadd.f32 %v2865_v49, %v2864_v48 }
0x1d13   :  { %v2876_v38 = vrot.slane %v2875_v42, 2 }
0x1d14   :  { %v2867_v60 = vrot.slane %v2866_v8, 2 }
0x1d15   :  { %v2877_v14 = vadd.f32 %v2876_v38, %v2875_v42 }
0x1d16   :  { %v2868_v50 = vadd.f32 %v2867_v60, %v2866_v8 }
0x1d17   :  { %v2878_v43 = vrot.slane %v2877_v14, 1 }
0x1d18   :  { %v2869_v62 = vrot.slane %v2868_v50, 1 }
0x1d19   :  { %v2879_v53 = vadd.f32 %v2878_v43, %v2877_v14 }
0x1d1a   :  { %v2870_v12 = vadd.f32 %v2869_v62, %v2868_v50 }
0x1d1b   :  { %v2880_v36 = vmul.f32 0.125, %v2879_v53 }
0x1d1c   :  { %v2872_v54 = vmul.f32 0.125, %v2870_v12 }
0x1d1e   :  { %v2882_v55 = vsel %vm2881_vm15, %v2872_v54, %v2880_v36 }
0x1d1f   :  { %3515 = vmatmul.mubr.msk.f32.vlgmr.msra.gmra.mrb[30].mxu0 %vm156_vm4, %v2882_v55 }
0x1df2   :  { %v2960_v56 = vpop.f32.mrb[30].mxu0 }
0x1df3   :  { %v2961_v57 = vadd.f32 %v2960_v56, %v2890_v61  ;;  %v3516_v59 = vpop.f32.mrb[31].mxu0 }
0x1df5   :  { %2964 = vst [vmem:[#allocation2] sm:$0x3] %v2961_v57 }
0x1df6   :  { %3951 = shalt.err (!%p3948_p4)
}
0x1df7   :  { %s3952_s20 = scalar_lea.hbm %s4678_s10, 32 }
0x1df8   :  { %p3953_p5 = scmp.ne.s32.totalorder %s4678_s10, %s3952_s20  ;;  %p3956_p6 = scmp.lt.u32.totalorder %s3952_s20, %s4678_s10 }
0x1dfa   :  { %p3958_p7 = pnand %p3956_p6, %p3953_p5 }
0x1dfc   :  { %3961 = shalt.err (!%p3958_p7)
}
0x1dfd   :  { %2974 = dma.vmem_to_hbm [thread:$0]  %s2972_s9, 32, %s4678_s10, [#allocation3]  }
0x1dfe   :  { %3962 = dma.done.wait [#allocation3], 32  }
0x1dff   :  { %3963 = vsyncadd [#allocation3], 4294967264 }
0x1e00   :  { %2978 = vsyncpa [#allocation3], 1 }

</bundles_post_ra>
